<compile_context>
chip_gen: v6e
topology: v6e:2x2x1
jax: 0.10.0
libtpu: 0.0.40
codegen_flags: <defaults>
</compile_context>

<pallas_src>
import jax
import jax.numpy as jnp
from jax.experimental import pallas as pl
from jax.experimental.pallas import tpu as pltpu

COMMON = 512          # common_embed_dim
IMG_FEAT = 2048       # image backbone feature dim
TXT_HID = 512         # text backbone hidden dim


def _head_kernel(img_ref, txt_ref,
                 w_img_ref, w_txt_ref, b_ref,
                 w2_ref, b2_ref,
                 out_ref):
    # Fused first layer (fc_image/fc_text folded into fc_combined[0]):
    #   h = relu(img @ Wf_img + txt_mean @ Wf_txt + b_fused)
    h = (jnp.dot(img_ref[...], w_img_ref[...], preferred_element_type=jnp.float32)
         + jnp.dot(txt_ref[...], w_txt_ref[...], preferred_element_type=jnp.float32)
         + b_ref[...])
    h = jnp.maximum(h, 0.0)

    # fc_combined[2]: Linear(512 -> 1) as VPU multiply + lane reduction
    # (avoids a 1-column MXU matmul); bias added in the epilogue.
    out_ref[...] = jnp.sum(h * w2_ref[...], axis=-1, keepdims=True) + b2_ref[...]


def _round_up(x, m):
    return (x + m - 1) // m * m


def fold_params(params):
    """Fold fc_image/fc_text into fc_combined[0] (exact) and cast streamed weights to bf16."""
    w_img_f = (params["w_img"] @ params["w1a"]).astype(jnp.bfloat16)           # [2048, 512]
    w_txt_f = (params["w_txt"] @ params["w1b"]).astype(jnp.bfloat16)           # [512, 512]
    b_f = (params["b_img"] @ params["w1a"]
           + params["b_txt"] @ params["w1b"]
           + params["b1"]).astype(jnp.float32)                                 # [1, 512]
    w2_row = params["w2"].reshape(1, COMMON).astype(jnp.float32)               # [1, 512]
    b2 = params["b2"].reshape(1, 1).astype(jnp.float32)                        # [1, 1]
    return w_img_f, w_txt_f, b_f, w2_row, b2


def alignment_head(image_features, text_hidden, folded, *, block_b=256):
    """Pallas forward of the alignment-prediction head.

    image_features: [B, 2048] f32   (flattened image-backbone output)
    text_hidden   : [B, S, 512] f32 (T5-small last_hidden_state)
    folded        : output of fold_params(...)
    returns       : [B, 1] f32
    """
    B = image_features.shape[0]
    w_img_f, w_txt_f, b_f, w2_row, b2 = folded

    # Sequence mean outside the kernel: avoids DMAing the whole [B, S, 512]
    # tensor into VMEM and removes an in-kernel sublane reduction.
    text_mean = jnp.mean(text_hidden.astype(jnp.float32), axis=1)

    # bf16 activations: native MXU input dtype, halves activation DMA bytes.
    img = image_features.astype(jnp.bfloat16)
    txt = text_mean.astype(jnp.bfloat16)

    # Batch blocking: 256 rows matches the v6e/v7x MXU; tiny batches are padded
    # to a multiple of 8 (sublane) and run as a single grid step.
    # (On v5e, block_b=128 matches the 4x128^2 MXU.)
    tb = block_b if B >= block_b else _round_up(B, 8)
    b_pad = _round_up(B, tb)
    if b_pad != B:
        img = jnp.pad(img, ((0, b_pad - B), (0, 0)))
        txt = jnp.pad(txt, ((0, b_pad - B), (0, 0)))
    grid = (b_pad // tb,)

    flops = 2 * b_pad * (IMG_FEAT + TXT_HID + 1) * COMMON
    bytes_accessed = ((w_img_f.size + w_txt_f.size) * 2            # bf16 weights
                      + (b_f.size + w2_row.size + b2.size) * 4     # f32 bias/head
                      + (img.size + txt.size) * 2                  # bf16 activations
                      + b_pad * 4)                                 # f32 output

    out = pl.pallas_call(
        _head_kernel,
        out_shape=jax.ShapeDtypeStruct((b_pad, 1), jnp.float32),
        grid=grid,
        in_specs=[
            pl.BlockSpec((tb, IMG_FEAT), lambda i: (i, 0)),        # image activations (blocked)
            pl.BlockSpec((tb, TXT_HID), lambda i: (i, 0)),         # text activations (blocked)
            pl.BlockSpec((IMG_FEAT, COMMON), lambda i: (0, 0)),    # fused image weight (resident)
            pl.BlockSpec((TXT_HID, COMMON), lambda i: (0, 0)),     # fused text weight (resident)
            pl.BlockSpec((1, COMMON), lambda i: (0, 0)),           # fused bias
            pl.BlockSpec((1, COMMON), lambda i: (0, 0)),           # final weight row
            pl.BlockSpec((1, 1), lambda i: (0, 0)),                # final bias (epilogue add)
        ],
        out_specs=pl.BlockSpec((tb, 1), lambda i: (i, 0)),
        compiler_params=pltpu.CompilerParams(
            dimension_semantics=("parallel",),
            vmem_limit_bytes=32 * 1024 * 1024,
        ),
        cost_estimate=pl.CostEstimate(
            flops=flops, transcendentals=0, bytes_accessed=bytes_accessed),
    )(img, txt, w_img_f, w_txt_f, b_f, w2_row, b2)
    return out[:B]


def init_params(key):
    """Deterministic synthetic parameters (shapes from the module __init__)."""
    ks = jax.random.split(key, 8)
    scale = 0.02
    w_img = scale * jax.random.normal(ks[0], (IMG_FEAT, COMMON), jnp.float32)
    b_img = scale * jax.random.normal(ks[1], (1, COMMON), jnp.float32)
    w_txt = scale * jax.random.normal(ks[2], (TXT_HID, COMMON), jnp.float32)
    b_txt = scale * jax.random.normal(ks[3], (1, COMMON), jnp.float32)
    # fc_combined[0]: Linear(2*COMMON -> COMMON); stored transposed (in, out)
    w1 = scale * jax.random.normal(ks[4], (2 * COMMON, COMMON), jnp.float32)
    b1 = scale * jax.random.normal(ks[5], (1, COMMON), jnp.float32)
    # fc_combined[2]: Linear(COMMON -> 1)
    w2 = scale * jax.random.normal(ks[6], (COMMON, 1), jnp.float32)
    b2 = scale * jax.random.normal(ks[7], (1, 1), jnp.float32)
    return {
        "w_img": w_img, "b_img": b_img,
        "w_txt": w_txt, "b_txt": b_txt,
        "w1a": w1[:COMMON], "w1b": w1[COMMON:], "b1": b1,
        "w2": w2, "b2": b2,
    }


def reference(image_features, text_hidden, p):
    """Un-fused f32 reference matching the original PyTorch module math."""
    img_e = image_features @ p["w_img"] + p["b_img"]
    txt_e = text_hidden.mean(axis=1) @ p["w_txt"] + p["b_txt"]
    h = jnp.concatenate([img_e, txt_e], axis=1)
    w1 = jnp.concatenate([p["w1a"], p["w1b"]], axis=0)
    h = jnp.maximum(h @ w1 + p["b1"], 0.0)
    return h @ p["w2"] + p["b2"]


if __name__ == "__main__":
    # TODO(synk): image_model / text_model (T5) backbones + tokenizer are
    # external pretrained nets; their pooled outputs are taken as kernel inputs.
    key = jax.random.PRNGKey(0)
    k_img, k_txt, k_par = jax.random.split(key, 3)

    B, S = 2, 8
    image_features = jax.random.normal(k_img, (B, IMG_FEAT), jnp.float32)
    text_hidden = jax.random.normal(k_txt, (B, S, TXT_HID), jnp.float32)
    params = init_params(k_par)
    folded = fold_params(params)

    out = alignment_head(image_features, text_hidden, folded)
    out = jax.block_until_ready(out)

    ref = reference(image_features, text_hidden, params)
    assert out.shape == (B, 1)
    # bf16 weight/activation streaming (f32 accumulation) -> loosened tolerance.
    assert jnp.allclose(out, ref, atol=1e-2, rtol=1e-2), (out, ref)
    print("KERNEL_OK")
</pallas_src>

<mosaic_0001>
module attributes {stable_mosaic.version = 11 : i64} {
  func.func @_head_kernel(%arg0: i32, %arg1: memref<8x2048xbf16, #tpu.memory_space<vmem>>, %arg2: memref<8x512xbf16, #tpu.memory_space<vmem>>, %arg3: memref<2048x512xbf16, #tpu.memory_space<vmem>>, %arg4: memref<512x512xbf16, #tpu.memory_space<vmem>>, %arg5: memref<1x512xf32, #tpu.memory_space<vmem>>, %arg6: memref<1x512xf32, #tpu.memory_space<vmem>>, %arg7: memref<1x1xf32, #tpu.memory_space<vmem>>, %arg8: memref<8x1xf32, #tpu.memory_space<vmem>>) attributes {dimension_semantics = [#tpu.dimension_semantics<parallel>], iteration_bounds = array<i64: 1>, scalar_prefetch = 0 : i64, scratch_operands = 0 : i64, tpu.core_type = #tpu.core_type<tc>, window_params = [{transform_indices = @transform_0, window_bounds = array<i64: 8, 2048>}, {transform_indices = @transform_1, window_bounds = array<i64: 8, 512>}, {pipeline_mode = #tpu.pipeline_mode<synchronous>, transform_indices = @transform_2, window_bounds = array<i64: 2048, 512>}, {pipeline_mode = #tpu.pipeline_mode<synchronous>, transform_indices = @transform_3, window_bounds = array<i64: 512, 512>}, {pipeline_mode = #tpu.pipeline_mode<synchronous>, transform_indices = @transform_4, window_bounds = array<i64: 1, 512>}, {pipeline_mode = #tpu.pipeline_mode<synchronous>, transform_indices = @transform_5, window_bounds = array<i64: 1, 512>}, {pipeline_mode = #tpu.pipeline_mode<synchronous>, transform_indices = @transform_6, window_bounds = array<i64: 1, 1>}, {transform_indices = @transform_7, window_bounds = array<i64: 8, 1>}]} {
    %c0 = arith.constant 0 : index
    %c0_0 = arith.constant 0 : index
    %0 = vector.load %arg1[%c0, %c0_0] : memref<8x2048xbf16, #tpu.memory_space<vmem>>, vector<8x2048xbf16>
    %c0_1 = arith.constant 0 : index
    %c0_2 = arith.constant 0 : index
    %1 = vector.load %arg3[%c0_1, %c0_2] : memref<2048x512xbf16, #tpu.memory_space<vmem>>, vector<2048x512xbf16>
    %cst = arith.constant dense<0.000000e+00> : vector<8x512xf32>
    %2 = tpu.matmul %0, %1, %cst {dimension_numbers = #tpu.dot_dimension_numbers<[1], [0], [0], [1], [0, 0, 1, 1], [], []>} : vector<8x2048xbf16>, vector<2048x512xbf16>, vector<8x512xf32> -> vector<8x512xf32>
    %c0_3 = arith.constant 0 : index
    %c0_4 = arith.constant 0 : index
    %3 = vector.load %arg2[%c0_3, %c0_4] : memref<8x512xbf16, #tpu.memory_space<vmem>>, vector<8x512xbf16>
    %c0_5 = arith.constant 0 : index
    %c0_6 = arith.constant 0 : index
    %4 = vector.load %arg4[%c0_5, %c0_6] : memref<512x512xbf16, #tpu.memory_space<vmem>>, vector<512x512xbf16>
    %cst_7 = arith.constant dense<0.000000e+00> : vector<8x512xf32>
    %5 = tpu.matmul %3, %4, %cst_7 {dimension_numbers = #tpu.dot_dimension_numbers<[1], [0], [0], [1], [0, 0, 1, 1], [], []>} : vector<8x512xbf16>, vector<512x512xbf16>, vector<8x512xf32> -> vector<8x512xf32>
    %6 = arith.addf %2, %5 : vector<8x512xf32>
    %c0_8 = arith.constant 0 : index
    %c0_9 = arith.constant 0 : index
    %7 = vector.load %arg5[%c0_8, %c0_9] : memref<1x512xf32, #tpu.memory_space<vmem>>, vector<1x512xf32>
    %8 = vector.broadcast %7 : vector<1x512xf32> to vector<8x512xf32>
    %9 = arith.addf %6, %8 : vector<8x512xf32>
    %cst_10 = arith.constant 0.000000e+00 : f32
    %10 = vector.broadcast %cst_10 : f32 to vector<8x512xf32>
    %11 = arith.maximumf %9, %10 : vector<8x512xf32>
    %c0_11 = arith.constant 0 : index
    %c0_12 = arith.constant 0 : index
    %12 = vector.load %arg6[%c0_11, %c0_12] : memref<1x512xf32, #tpu.memory_space<vmem>>, vector<1x512xf32>
    %13 = vector.broadcast %12 : vector<1x512xf32> to vector<8x512xf32>
    %14 = arith.mulf %11, %13 : vector<8x512xf32>
    %cst_13 = arith.constant dense<0.000000e+00> : vector<8xf32>
    %15 = vector.multi_reduction <add>, %14, %cst_13 [1] : vector<8x512xf32> to vector<8xf32>
    %16 = vector.shape_cast %15 : vector<8xf32> to vector<8x1xf32>
    %c0_14 = arith.constant 0 : index
    %c0_15 = arith.constant 0 : index
    %17 = vector.load %arg7[%c0_14, %c0_15] : memref<1x1xf32, #tpu.memory_space<vmem>>, vector<1x1xf32>
    %18 = vector.broadcast %17 : vector<1x1xf32> to vector<8x1xf32>
    %19 = arith.addf %16, %18 : vector<8x1xf32>
    %c0_16 = arith.constant 0 : index
    %c0_17 = arith.constant 0 : index
    %20 = vector.load %arg8[%c0_16, %c0_17] : memref<8x1xf32, #tpu.memory_space<vmem>>, vector<8x1xf32>
    tpu.vector_store %arg8[%c0_16, %c0_17], %19 {strides = array<i32>} : memref<8x1xf32, #tpu.memory_space<vmem>>, vector<8x1xf32>,
    return
  }
  func.func @transform_0(%arg0: i32) -> (i32, i32) {
    %c0_i32 = arith.constant 0 : i32
    %c0_i32_0 = arith.constant 0 : i32
    return %arg0, %c0_i32 : i32, i32
  }
  func.func @transform_1(%arg0: i32) -> (i32, i32) {
    %c0_i32 = arith.constant 0 : i32
    %c0_i32_0 = arith.constant 0 : i32
    return %arg0, %c0_i32 : i32, i32
  }
  func.func @transform_2(%arg0: i32) -> (i32, i32) {
    %c0_i32 = arith.constant 0 : i32
    %c0_i32_0 = arith.constant 0 : i32
    %c0_i32_1 = arith.constant 0 : i32
    return %c0_i32, %c0_i32_0 : i32, i32
  }
  func.func @transform_3(%arg0: i32) -> (i32, i32) {
    %c0_i32 = arith.constant 0 : i32
    %c0_i32_0 = arith.constant 0 : i32
    %c0_i32_1 = arith.constant 0 : i32
    return %c0_i32, %c0_i32_0 : i32, i32
  }
  func.func @transform_4(%arg0: i32) -> (i32, i32) {
    %c0_i32 = arith.constant 0 : i32
    %c0_i32_0 = arith.constant 0 : i32
    %c0_i32_1 = arith.constant 0 : i32
    return %c0_i32, %c0_i32_0 : i32, i32
  }
  func.func @transform_5(%arg0: i32) -> (i32, i32) {
    %c0_i32 = arith.constant 0 : i32
    %c0_i32_0 = arith.constant 0 : i32
    %c0_i32_1 = arith.constant 0 : i32
    return %c0_i32, %c0_i32_0 : i32, i32
  }
  func.func @transform_6(%arg0: i32) -> (i32, i32) {
    %c0_i32 = arith.constant 0 : i32
    %c0_i32_0 = arith.constant 0 : i32
    %c0_i32_1 = arith.constant 0 : i32
    return %c0_i32, %c0_i32_0 : i32, i32
  }
  func.func @transform_7(%arg0: i32) -> (i32, i32) {
    %c0_i32 = arith.constant 0 : i32
    %c0_i32_0 = arith.constant 0 : i32
    return %arg0, %c0_i32 : i32, i32
  }
}

</mosaic_0001>

<bundles_post_ra>
// kernel: tpu_custom_call.1
= control target key start
LH: loop header
LB: loop body
LE: loop exit
PB: predicated region body
PF: predicated region fallthrough
CT: control target
= control target key end

     0   :  { %s6945_s0 = inlined_call_operand.hbm [shape: bf16[8,2048], index: 0, kind: input, shape index: {}]   ;;  %s6946_s1 = inlined_call_operand.hbm [shape: bf16[8,512], index: 1, kind: input, shape index: {}]   ;;  %s6947_s2 = inlined_call_operand.hbm [shape: bf16[2048,512], index: 2, kind: input, shape index: {}]   ;;  %s6948_s3 = inlined_call_operand.hbm [shape: bf16[512,512], index: 3, kind: input, shape index: {}]   ;;  %s6949_s4 = inlined_call_operand.hbm [shape: f32[1,512], index: 4, kind: input, shape index: {}]   ;;  %s6950_s5 = inlined_call_operand.hbm [shape: f32[1,512], index: 5, kind: input, shape index: {}]   ;;  %s6951_s6 = inlined_call_operand.<no memory space> [shape: f32[1,1], index: 6, kind: input, shape index: {}]   ;;  %s6952_s7 = inlined_call_operand.vmem [shape: f32[8,1], index: 7, kind: output, shape index: {}]  }
   0x1   :  { %v12_v0 = vstv %s6951_s6 }
   0x2   :  { %13 = vst [vmem:[#allocation2] sm:$0x1] %v12_v0 }
   0x3   :  { %14 = vsyncpa [#allocation4], 0 }
   0x4   :  { %15 = vsyncpa [#allocation6], 0 }
   0x5   :  { %16 = vsyncpa [#allocation9], 0 }
   0x6   :  { %17 = vsyncpa [#allocation12], 0  ;;  %s6698_s26 = smov [#allocation5]  }
   0x7   :  { %s34_s27 = sshll.u32 %s6698_s26, 4  ;;  %s35_s27 = int_to_ptr.vmem [resolvable:$true] %s34_s27 }
   0x8   :  { %s6578_s28 = scalar_lea.vmem %s35_s27, 256  ;;  %p6583_p1 = scmp.lt.s32.totalorder %s35_s27, %s35_s27 }
   0x9   :  { %p6579_p0 = scmp.ne.s32.totalorder %s35_s27, %s6578_s28  ;;  %p6584_p2 = scmp.lt.s32.totalorder %s6578_s28, %s6578_s28 }
   0xb   :  { %p6585_p3 = por %p6584_p2, %p6583_p1 }
   0xd   :  { %p6586_p4 = pnand %p6585_p3, %p6579_p0 }
   0xf   :  { %6589 = shalt.err (!%p6586_p4)
}
  0x10   :  { %37 = dma.hbm_to_vmem [thread:$0]  %s6946_s1, 256, %s35_s27, [#allocation6]  }
  0x11   :  { %s6699_s6 = smov [#allocation8]   ;;  %s6700_s9 = smov [#allocation3]  }
  0x12   :  { %s55_s8 = sshll.u32 %s6699_s6, 4  ;;  %s24_s10 = sshll.u32 %s6700_s9, 4  ;;  %s56_s8 = int_to_ptr.vmem [resolvable:$true] %s55_s8  ;;  %s25_s10 = int_to_ptr.vmem [resolvable:$true] %s24_s10 }
  0x13   :  { %s6598_s11 = scalar_lea.vmem %s56_s8, 16384  ;;  %p6603_p6 = scmp.lt.s32.totalorder %s56_s8, %s56_s8 }
  0x14   :  { %p6599_p5 = scmp.ne.s32.totalorder %s56_s8, %s6598_s11  ;;  %p6604_p7 = scmp.lt.s32.totalorder %s6598_s11, %s6598_s11 }
  0x16   :  { %p6605_p8 = por %p6604_p7, %p6603_p6 }
  0x18   :  { %p6606_p9 = pnand %p6605_p8, %p6599_p5 }
  0x1a   :  { %6609 = shalt.err (!%p6606_p9)
}
  0x1b   :  { %s6701_s12 = smov 256   ;;  %s6702_s13 = smov 16  }
  0x1c   :  { %61 = dma.hbm_to_vmem [thread:$0]  %s6948_s3, 16384, %s56_s8, [#allocation9], %s6701_s12, %s6701_s12, %s6702_s13  }
  0x1d   :  { %s6618_s1 = scalar_lea.vmem %s25_s10, 1024  ;;  %p6623_p11 = scmp.lt.s32.totalorder %s25_s10, %s25_s10 }
  0x1e   :  { %p6619_p10 = scmp.ne.s32.totalorder %s25_s10, %s6618_s1  ;;  %p6624_p12 = scmp.lt.s32.totalorder %s6618_s1, %s6618_s1 }
  0x20   :  { %p6625_p13 = por %p6624_p12, %p6623_p11 }
  0x22   :  { %p6626_p0 = pnand %p6625_p13, %p6619_p10 }
  0x24   :  { %6629 = shalt.err (!%p6626_p0)
}
  0x25   :  { %27 = dma.hbm_to_vmem [thread:$0]  %s6945_s0, 1024, %s25_s10, [#allocation4]  }
  0x26   :  { %s6703_s18 = smov [#allocation7]   ;;  %s6704_s20 = smov [#allocation10]  }
  0x27   :  { %s43_s19 = sshll.u32 %s6703_s18, 4  ;;  %s68_s21 = sshll.u32 %s6704_s20, 4  ;;  %s44_s19 = int_to_ptr.vmem [resolvable:$true] %s43_s19  ;;  %s69_s21 = int_to_ptr.vmem [resolvable:$true] %s68_s21 }
  0x28   :  { %s6638_s22 = scalar_lea.vmem %s44_s19, 65536  ;;  %p6643_p2 = scmp.lt.s32.totalorder %s44_s19, %s44_s19 }
  0x29   :  { %p6639_p1 = scmp.ne.s32.totalorder %s44_s19, %s6638_s22  ;;  %p6644_p3 = scmp.lt.s32.totalorder %s6638_s22, %s6638_s22 }
  0x2b   :  { %p6645_p4 = por %p6644_p3, %p6643_p2 }
  0x2d   :  { %p6646_p5 = pnand %p6645_p4, %p6639_p1 }
  0x2f   :  { %6649 = shalt.err (!%p6646_p5)
}
  0x30   :  { %49 = dma.hbm_to_vmem [thread:$0]  %s6947_s2, 65536, %s44_s19, [#allocation6], %s6701_s12, %s6701_s12, %s6702_s13  }
  0x31   :  { %s6658_s24 = scalar_lea.vmem %s69_s21, 64  ;;  %p6663_p7 = scmp.lt.s32.totalorder %s69_s21, %s69_s21 }
  0x32   :  { %p6659_p6 = scmp.ne.s32.totalorder %s69_s21, %s6658_s24  ;;  %p6664_p8 = scmp.lt.s32.totalorder %s6658_s24, %s6658_s24 }
  0x34   :  { %p6665_p9 = por %p6664_p8, %p6663_p7 }
  0x36   :  { %p6666_p10 = pnand %p6665_p9, %p6659_p6 }
  0x38   :  { %6669 = shalt.err (!%p6666_p10)
}
  0x39   :  { %71 = dma.hbm_to_vmem [thread:$0]  %s6949_s4, 64, %s69_s21, [#allocation9]  }
  0x3a   :  { %s6705_s26 = smov [#allocation11]  }
  0x3b   :  { %s78_s27 = sshll.u32 %s6705_s26, 4  ;;  %s79_s27 = int_to_ptr.vmem [resolvable:$true] %s78_s27 }
  0x3c   :  { %s6678_s28 = scalar_lea.vmem %s79_s27, 64  ;;  %p6683_p12 = scmp.lt.s32.totalorder %s79_s27, %s79_s27 }
  0x3d   :  { %p6679_p11 = scmp.ne.s32.totalorder %s79_s27, %s6678_s28  ;;  %p6684_p13 = scmp.lt.s32.totalorder %s6678_s28, %s6678_s28 }
  0x3f   :  { %p6685_p0 = por %p6684_p13, %p6683_p12 }
  0x41   :  { %p6686_p1 = pnand %p6685_p0, %p6679_p11 }
  0x43   :  { %6689 = shalt.err (!%p6686_p1)
}
  0x44   :  { %81 = dma.hbm_to_vmem [thread:$0]  %s6950_s5, 64, %s79_s27, [#allocation12]  }
  0x45   :  { %6690 = dma.done.wait [#allocation4], 1024  }
  0x46   :  { %6691 = vsyncadd [#allocation4], 4294966272 }
  0x47   :  { %6692 = dma.done.wait [#allocation6], 65792  }
  0x48   :  { %6693 = vsyncadd [#allocation6], 4294901504 }
  0x49   :  { %6694 = dma.done.wait [#allocation9], 16448  }
  0x4a   :  { %6695 = vsyncadd [#allocation9], 4294950848 }
  0x4b   :  { %6696 = dma.done.wait [#allocation12], 64  }
  0x4c   :  { %6697 = vsyncadd [#allocation12], 4294967232  ;;  %v5590_v1 = vld [vmem:[#allocation8 + $0xe4] ss:$16 sps:$4 sm:$0xff]   ;;  %v5594_v3 = vld [vmem:[#allocation8 + $0xe0] ss:$16 sps:$4 sm:$0xff]  }
  0x4d   :  { %v5592_v2 = vld [vmem:[#allocation8 + $0x2e4] ss:$16 sps:$4 sm:$0xff]   ;;  %1406 = vmatprep.subr.bf16.mxu0 %v5590_v1  ;;  %v5595_v4 = vld [vmem:[#allocation8 + $0x2e0] ss:$16 sps:$4 sm:$0xff]   ;;  %v623_v49 = vld [vmem:[#allocation5 + $0x8] sm:$0xff]  ;;  %vm4911_vm0 = vcmask 7168  }
  0x4e   :  { %1447 = vmatprep.subr.bf16.mxu1 %v5592_v2  ;;  %v5596_v5 = vld [vmem:[#allocation8 + $0xc4] ss:$16 sps:$4 sm:$0xff]   ;;  %1407 = vmatpush1.bf16.msra.mxu0 %v5594_v3  ;;  %v5600_v7 = vld [vmem:[#allocation8 + $0xc0] ss:$16 sps:$4 sm:$0xff]   ;;  %v4924_v52 = vcombine.high %v623_v49, %v623_v49 }
  0x4f   :  { %1448 = vmatpush1.bf16.msra.mxu1 %v5595_v4  ;;  %v5598_v6 = vld [vmem:[#allocation8 + $0x2c4] ss:$16 sps:$4 sm:$0xff]   ;;  %1408 = vmatprep.subr.bf16.mxu0 %v5596_v5  ;;  %v5601_v8 = vld [vmem:[#allocation8 + $0x2c0] ss:$16 sps:$4 sm:$0xff]   ;;  %v5692_v5 = vld [vmem:[#allocation8 + $0xec] ss:$16 sps:$4 sm:$0xff]  }
  0x50   :  { %1449 = vmatprep.subr.bf16.mxu1 %v5598_v6  ;;  %v5602_v9 = vld [vmem:[#allocation8 + $0xa4] ss:$16 sps:$4 sm:$0xff]   ;;  %v5606_v11 = vld [vmem:[#allocation8 + $0xa0] ss:$16 sps:$4 sm:$0xff]   ;;  %1479 = vmatprep.mubr.bf16.mxu1 %v4924_v52  ;;  %v5695_v6 = vld [vmem:[#allocation8 + $0x2ec] ss:$16 sps:$4 sm:$0xff]  }
  0x51   :  { %v5604_v10 = vld [vmem:[#allocation8 + $0x2a4] ss:$16 sps:$4 sm:$0xff]   ;;  %v5607_v12 = vld [vmem:[#allocation8 + $0x2a0] ss:$16 sps:$4 sm:$0xff]  }
  0x52   :  { %1409 = vmatpush1.bf16.msra.mxu0 %v5600_v7  ;;  %v5608_v13 = vld [vmem:[#allocation8 + $0x84] ss:$16 sps:$4 sm:$0xff]   ;;  %v5612_v15 = vld [vmem:[#allocation8 + $0x80] ss:$16 sps:$4 sm:$0xff]  }
  0x53   :  { %1450 = vmatpush1.bf16.msra.mxu1 %v5601_v8  ;;  %1410 = vmatprep.subr.bf16.mxu0 %v5602_v9  ;;  %v5610_v14 = vld [vmem:[#allocation8 + $0x284] ss:$16 sps:$4 sm:$0xff]   ;;  %v5613_v16 = vld [vmem:[#allocation8 + $0x280] ss:$16 sps:$4 sm:$0xff]   ;;  %v6772_v8 = vcombine.low %v623_v49, %v623_v49  ;;  %v5690_v9 = vld [vmem:[#allocation8 + $0xe8] ss:$16 sps:$4 sm:$0xff]  }
  0x54   :  { %1451 = vmatprep.subr.bf16.mxu1 %v5604_v10  ;;  %v5614_v17 = vld [vmem:[#allocation8 + $0x64] ss:$16 sps:$4 sm:$0xff]   ;;  %v5618_v19 = vld [vmem:[#allocation8 + $0x60] ss:$16 sps:$4 sm:$0xff]   ;;  %v5693_v10 = vld [vmem:[#allocation8 + $0x2e8] ss:$16 sps:$4 sm:$0xff]  }
  0x55   :  { %v5616_v18 = vld [vmem:[#allocation8 + $0x264] ss:$16 sps:$4 sm:$0xff]   ;;  %v5619_v20 = vld [vmem:[#allocation8 + $0x260] ss:$16 sps:$4 sm:$0xff]   ;;  %v5750_v49 = vld [vmem:[#allocation8 + $0x1a8] ss:$16 sps:$4 sm:$0xff]  }
  0x56   :  { %1411 = vmatpush1.bf16.msra.mxu0 %v5606_v11  ;;  %v5620_v21 = vld [vmem:[#allocation8 + $0x44] ss:$16 sps:$4 sm:$0xff]   ;;  %v5624_v23 = vld [vmem:[#allocation8 + $0x40] ss:$16 sps:$4 sm:$0xff]   ;;  %v5698_v11 = vld [vmem:[#allocation8 + $0xcc] ss:$16 sps:$4 sm:$0xff]  }
  0x57   :  { %1452 = vmatpush1.bf16.msra.mxu1 %v5607_v12  ;;  %1412 = vmatprep.subr.bf16.mxu0 %v5608_v13  ;;  %v5622_v22 = vld [vmem:[#allocation8 + $0x244] ss:$16 sps:$4 sm:$0xff]   ;;  %v5625_v24 = vld [vmem:[#allocation8 + $0x240] ss:$16 sps:$4 sm:$0xff]   ;;  %v5701_v12 = vld [vmem:[#allocation8 + $0x2cc] ss:$16 sps:$4 sm:$0xff]  }
  0x58   :  { %1453 = vmatprep.subr.bf16.mxu1 %v5610_v14  ;;  %v5626_v25 = vld [vmem:[#allocation8 + $0x24] ss:$16 sps:$4 sm:$0xff]   ;;  %v5630_v27 = vld [vmem:[#allocation8 + $0x20] ss:$16 sps:$4 sm:$0xff]   ;;  %v5696_v13 = vld [vmem:[#allocation8 + $0xc8] ss:$16 sps:$4 sm:$0xff]  }
  0x59   :  { %v5628_v26 = vld [vmem:[#allocation8 + $0x224] ss:$16 sps:$4 sm:$0xff]   ;;  %v5631_v28 = vld [vmem:[#allocation8 + $0x220] ss:$16 sps:$4 sm:$0xff]   ;;  %v5699_v14 = vld [vmem:[#allocation8 + $0x2c8] ss:$16 sps:$4 sm:$0xff]  }
  0x5a   :  { %1413 = vmatpush1.bf16.msra.mxu0 %v5612_v15  ;;  %v5632_v29 = vld [vmem:[#allocation8 + $0x4] ss:$16 sps:$4 sm:$0xff]   ;;  %v5636_v31 = vld [vmem:[#allocation8] ss:$16 sps:$4 sm:$0xff]   ;;  %v5704_v15 = vld [vmem:[#allocation8 + $0xac] ss:$16 sps:$4 sm:$0xff]  }
  0x5b   :  { %1454 = vmatpush1.bf16.msra.mxu1 %v5613_v16  ;;  %1414 = vmatprep.subr.bf16.mxu0 %v5614_v17  ;;  %v5634_v30 = vld [vmem:[#allocation8 + $0x204] ss:$16 sps:$4 sm:$0xff]   ;;  %v5637_v32 = vld [vmem:[#allocation8 + $0x200] ss:$16 sps:$4 sm:$0xff]   ;;  %v5707_v16 = vld [vmem:[#allocation8 + $0x2ac] ss:$16 sps:$4 sm:$0xff]  }
  0x5c   :  { %1455 = vmatprep.subr.bf16.mxu1 %v5616_v18  ;;  %v5638_v33 = vld [vmem:[#allocation8 + $0x1e4] ss:$16 sps:$4 sm:$0xff]   ;;  %v5642_v35 = vld [vmem:[#allocation8 + $0x1e0] ss:$16 sps:$4 sm:$0xff]   ;;  %v5702_v17 = vld [vmem:[#allocation8 + $0xa8] ss:$16 sps:$4 sm:$0xff]  }
  0x5d   :  { %v5640_v34 = vld [vmem:[#allocation8 + $0x3e4] ss:$16 sps:$4 sm:$0xff]   ;;  %v5643_v36 = vld [vmem:[#allocation8 + $0x3e0] ss:$16 sps:$4 sm:$0xff]   ;;  %v5705_v18 = vld [vmem:[#allocation8 + $0x2a8] ss:$16 sps:$4 sm:$0xff]  }
  0x5e   :  { %1415 = vmatpush1.bf16.msra.mxu0 %v5618_v19  ;;  %v5644_v37 = vld [vmem:[#allocation8 + $0x1c4] ss:$16 sps:$4 sm:$0xff]   ;;  %v5648_v39 = vld [vmem:[#allocation8 + $0x1c0] ss:$16 sps:$4 sm:$0xff]   ;;  %v5710_v19 = vld [vmem:[#allocation8 + $0x8c] ss:$16 sps:$4 sm:$0xff]  }
  0x5f   :  { %1456 = vmatpush1.bf16.msra.mxu1 %v5619_v20  ;;  %1416 = vmatprep.subr.bf16.mxu0 %v5620_v21  ;;  %v5646_v38 = vld [vmem:[#allocation8 + $0x3c4] ss:$16 sps:$4 sm:$0xff]   ;;  %v5649_v40 = vld [vmem:[#allocation8 + $0x3c0] ss:$16 sps:$4 sm:$0xff]   ;;  %v5713_v20 = vld [vmem:[#allocation8 + $0x28c] ss:$16 sps:$4 sm:$0xff]  }
  0x60   :  { %1457 = vmatprep.subr.bf16.mxu1 %v5622_v22  ;;  %v5650_v41 = vld [vmem:[#allocation8 + $0x1a4] ss:$16 sps:$4 sm:$0xff]   ;;  %v5654_v43 = vld [vmem:[#allocation8 + $0x1a0] ss:$16 sps:$4 sm:$0xff]   ;;  %v5708_v21 = vld [vmem:[#allocation8 + $0x88] ss:$16 sps:$4 sm:$0xff]  }
  0x61   :  { %v5652_v42 = vld [vmem:[#allocation8 + $0x3a4] ss:$16 sps:$4 sm:$0xff]   ;;  %v5655_v44 = vld [vmem:[#allocation8 + $0x3a0] ss:$16 sps:$4 sm:$0xff]   ;;  %v5711_v22 = vld [vmem:[#allocation8 + $0x288] ss:$16 sps:$4 sm:$0xff]  }
  0x62   :  { %1417 = vmatpush1.bf16.msra.mxu0 %v5624_v23  ;;  %v5656_v45 = vld [vmem:[#allocation8 + $0x184] ss:$16 sps:$4 sm:$0xff]   ;;  %v5660_v50 = vld [vmem:[#allocation8 + $0x180] ss:$16 sps:$4 sm:$0xff]   ;;  %v5716_v23 = vld [vmem:[#allocation8 + $0x6c] ss:$16 sps:$4 sm:$0xff]  }
  0x63   :  { %1458 = vmatpush1.bf16.msra.mxu1 %v5625_v24  ;;  %1418 = vmatprep.subr.bf16.mxu0 %v5626_v25  ;;  %v5658_v46 = vld [vmem:[#allocation8 + $0x384] ss:$16 sps:$4 sm:$0xff]   ;;  %v5661_v51 = vld [vmem:[#allocation8 + $0x380] ss:$16 sps:$4 sm:$0xff]   ;;  %v5719_v24 = vld [vmem:[#allocation8 + $0x26c] ss:$16 sps:$4 sm:$0xff]  }
  0x64   :  { %1459 = vmatprep.subr.bf16.mxu1 %v5628_v26  ;;  %v622_v47 = vld [vmem:[#allocation5] sm:$0xff]  ;;  %v5714_v25 = vld [vmem:[#allocation8 + $0x68] ss:$16 sps:$4 sm:$0xff]  }
  0x65   :  { %v6767_v48 = vcombine.high %v622_v47, %v622_v47  ;;  %v5662_v53 = vld [vmem:[#allocation8 + $0x164] ss:$16 sps:$4 sm:$0xff]   ;;  %v5666_v55 = vld [vmem:[#allocation8 + $0x160] ss:$16 sps:$4 sm:$0xff]   ;;  %v6770_v7 = vcombine.low %v622_v47, %v622_v47  ;;  %v5717_v26 = vld [vmem:[#allocation8 + $0x268] ss:$16 sps:$4 sm:$0xff]  }
  0x66   :  { %1419 = vmatpush1.bf16.msra.mxu0 %v5630_v27  ;;  %v5664_v54 = vld [vmem:[#allocation8 + $0x364] ss:$16 sps:$4 sm:$0xff]   ;;  %v5667_v56 = vld [vmem:[#allocation8 + $0x360] ss:$16 sps:$4 sm:$0xff]   ;;  %v5722_v27 = vld [vmem:[#allocation8 + $0x4c] ss:$16 sps:$4 sm:$0xff]  }
  0x67   :  { %1460 = vmatpush1.bf16.msra.mxu1 %v5631_v28  ;;  %1420 = vmatprep.subr.bf16.mxu0 %v5632_v29  ;;  %v5668_v57 = vld [vmem:[#allocation8 + $0x144] ss:$16 sps:$4 sm:$0xff]   ;;  %v5672_v59 = vld [vmem:[#allocation8 + $0x140] ss:$16 sps:$4 sm:$0xff]   ;;  %v5725_v28 = vld [vmem:[#allocation8 + $0x24c] ss:$16 sps:$4 sm:$0xff]  }
  0x68   :  { %1461 = vmatprep.subr.bf16.mxu1 %v5634_v30  ;;  %1438 = vmatprep.mubr.bf16.mxu0 %v6767_v48  ;;  %v5670_v58 = vld [vmem:[#allocation8 + $0x344] ss:$16 sps:$4 sm:$0xff]   ;;  %v5673_v60 = vld [vmem:[#allocation8 + $0x340] ss:$16 sps:$4 sm:$0xff]   ;;  %v5720_v29 = vld [vmem:[#allocation8 + $0x48] ss:$16 sps:$4 sm:$0xff]  }
  0x69   :  { %v5674_v61 = vld [vmem:[#allocation8 + $0x124] ss:$16 sps:$4 sm:$0xff]   ;;  %v5678_v63 = vld [vmem:[#allocation8 + $0x120] ss:$16 sps:$4 sm:$0xff]   ;;  %v5723_v30 = vld [vmem:[#allocation8 + $0x248] ss:$16 sps:$4 sm:$0xff]  }
  0x6a   :  { %1421 = vmatpush1.bf16.msra.mxu0 %v5636_v31  ;;  %v5676_v62 = vld [vmem:[#allocation8 + $0x324] ss:$16 sps:$4 sm:$0xff]   ;;  %v5679_v0 = vld [vmem:[#allocation8 + $0x320] ss:$16 sps:$4 sm:$0xff]   ;;  %v5728_v31 = vld [vmem:[#allocation8 + $0x2c] ss:$16 sps:$4 sm:$0xff]  }
  0x6b   :  { %1462 = vmatpush1.bf16.msra.mxu1 %v5637_v32  ;;  %1422 = vmatprep.subr.bf16.mxu0 %v5638_v33  ;;  %v5680_v1 = vld [vmem:[#allocation8 + $0x104] ss:$16 sps:$4 sm:$0xff]   ;;  %v5684_v3 = vld [vmem:[#allocation8 + $0x100] ss:$16 sps:$4 sm:$0xff]   ;;  %v5731_v32 = vld [vmem:[#allocation8 + $0x22c] ss:$16 sps:$4 sm:$0xff]  }
  0x6c   :  { %1463 = vmatprep.subr.bf16.mxu1 %v5640_v34  ;;  %v5682_v2 = vld [vmem:[#allocation8 + $0x304] ss:$16 sps:$4 sm:$0xff]   ;;  %v5685_v4 = vld [vmem:[#allocation8 + $0x300] ss:$16 sps:$4 sm:$0xff]   ;;  %v5726_v33 = vld [vmem:[#allocation8 + $0x28] ss:$16 sps:$4 sm:$0xff]  }
  0x6d   :  { %v5729_v34 = vld [vmem:[#allocation8 + $0x228] ss:$16 sps:$4 sm:$0xff]   ;;  %v5752_v47 = vld [vmem:[#allocation8 + $0x1ac] ss:$16 sps:$4 sm:$0xff]  }
  0x6e   :  { %1423 = vmatpush2.bf16.msra.mxu0 %v5642_v35  ;;  %v5734_v35 = vld [vmem:[#allocation8 + $0xc] ss:$16 sps:$4 sm:$0xff]  }
  0x6f   :  { %1464 = vmatpush2.bf16.msra.mxu1 %v5643_v36  ;;  %1424 = vmatprep.subr.bf16.mxu0 %v5644_v37  ;;  %v5737_v36 = vld [vmem:[#allocation8 + $0x20c] ss:$16 sps:$4 sm:$0xff]   ;;  %v5732_v37 = vld [vmem:[#allocation8 + $0x8] ss:$16 sps:$4 sm:$0xff]  }
  0x70   :  { %1465 = vmatprep.subr.bf16.mxu1 %v5646_v38  ;;  %v5735_v38 = vld [vmem:[#allocation8 + $0x208] ss:$16 sps:$4 sm:$0xff]  }
  0x72   :  { %1425 = vmatpush2.bf16.msra.mxu0 %v5648_v39  ;;  %v5740_v39 = vld [vmem:[#allocation8 + $0x1ec] ss:$16 sps:$4 sm:$0xff]  }
  0x73   :  { %1466 = vmatpush2.bf16.msra.mxu1 %v5649_v40  ;;  %1426 = vmatprep.subr.bf16.mxu0 %v5650_v41  ;;  %v5743_v40 = vld [vmem:[#allocation8 + $0x3ec] ss:$16 sps:$4 sm:$0xff]   ;;  %v5738_v41 = vld [vmem:[#allocation8 + $0x1e8] ss:$16 sps:$4 sm:$0xff]  }
  0x74   :  { %1467 = vmatprep.subr.bf16.mxu1 %v5652_v42  ;;  %v5741_v42 = vld [vmem:[#allocation8 + $0x3e8] ss:$16 sps:$4 sm:$0xff]  }
  0x76   :  { %1427 = vmatpush2.bf16.msra.mxu0 %v5654_v43  ;;  %v5746_v43 = vld [vmem:[#allocation8 + $0x1cc] ss:$16 sps:$4 sm:$0xff]  }
  0x77   :  { %1468 = vmatpush2.bf16.msra.mxu1 %v5655_v44  ;;  %1428 = vmatprep.subr.bf16.mxu0 %v5656_v45  ;;  %v5749_v44 = vld [vmem:[#allocation8 + $0x3cc] ss:$16 sps:$4 sm:$0xff]   ;;  %v5744_v45 = vld [vmem:[#allocation8 + $0x1c8] ss:$16 sps:$4 sm:$0xff]  }
  0x78   :  { %1469 = vmatprep.subr.bf16.mxu1 %v5658_v46  ;;  %v5747_v46 = vld [vmem:[#allocation8 + $0x3c8] ss:$16 sps:$4 sm:$0xff]  }
  0x7a   :  { %1429 = vmatpush2.bf16.msra.mxu0 %v5660_v50  ;;  %v5753_v50 = vld [vmem:[#allocation8 + $0x3a8] ss:$16 sps:$4 sm:$0xff]  }
  0x7b   :  { %1470 = vmatpush2.bf16.msra.mxu1 %v5661_v51  ;;  %1430 = vmatprep.subr.bf16.mxu0 %v5662_v53  ;;  %v5758_v51 = vld [vmem:[#allocation8 + $0x18c] ss:$16 sps:$4 sm:$0xff]   ;;  %v5756_v53 = vld [vmem:[#allocation8 + $0x188] ss:$16 sps:$4 sm:$0xff]  }
  0x7c   :  { %1471 = vmatprep.subr.bf16.mxu1 %v5664_v54  ;;  %v5759_v54 = vld [vmem:[#allocation8 + $0x388] ss:$16 sps:$4 sm:$0xff]  }
  0x7e   :  { %1431 = vmatpush2.bf16.msra.mxu0 %v5666_v55  ;;  %v5764_v55 = vld [vmem:[#allocation8 + $0x16c] ss:$16 sps:$4 sm:$0xff]  }
  0x7f   :  { %1472 = vmatpush2.bf16.msra.mxu1 %v5667_v56  ;;  %1432 = vmatprep.subr.bf16.mxu0 %v5668_v57  ;;  %v5767_v56 = vld [vmem:[#allocation8 + $0x36c] ss:$16 sps:$4 sm:$0xff]   ;;  %v5762_v57 = vld [vmem:[#allocation8 + $0x168] ss:$16 sps:$4 sm:$0xff]  }
  0x80   :  { %1473 = vmatprep.subr.bf16.mxu1 %v5670_v58  ;;  %v5765_v58 = vld [vmem:[#allocation8 + $0x368] ss:$16 sps:$4 sm:$0xff]  }
  0x82   :  { %1433 = vmatpush2.bf16.msra.mxu0 %v5672_v59  ;;  %v5770_v59 = vld [vmem:[#allocation8 + $0x14c] ss:$16 sps:$4 sm:$0xff]  }
  0x83   :  { %1474 = vmatpush2.bf16.msra.mxu1 %v5673_v60  ;;  %1434 = vmatprep.subr.bf16.mxu0 %v5674_v61  ;;  %v5773_v60 = vld [vmem:[#allocation8 + $0x34c] ss:$16 sps:$4 sm:$0xff]   ;;  %v5768_v61 = vld [vmem:[#allocation8 + $0x148] ss:$16 sps:$4 sm:$0xff]  }
  0x84   :  { %1475 = vmatprep.subr.bf16.mxu1 %v5676_v62  ;;  %v5771_v62 = vld [vmem:[#allocation8 + $0x348] ss:$16 sps:$4 sm:$0xff]  }
  0x86   :  { %1435 = vmatpush2.bf16.msra.mxu0 %v5678_v63  ;;  %v5776_v63 = vld [vmem:[#allocation8 + $0x12c] ss:$16 sps:$4 sm:$0xff]  }
  0x87   :  { %1476 = vmatpush2.bf16.msra.mxu1 %v5679_v0  ;;  %1436 = vmatprep.subr.bf16.mxu0 %v5680_v1  ;;  %v5779_v0 = vld [vmem:[#allocation8 + $0x32c] ss:$16 sps:$4 sm:$0xff]   ;;  %v5774_v1 = vld [vmem:[#allocation8 + $0x128] ss:$16 sps:$4 sm:$0xff]  }
  0x88   :  { %1477 = vmatprep.subr.bf16.mxu1 %v5682_v2  ;;  %v5777_v2 = vld [vmem:[#allocation8 + $0x328] ss:$16 sps:$4 sm:$0xff]  }
  0x8a   :  { %1437 = vmatpush2.bf16.msra.mxu0 %v5684_v3  ;;  %v5782_v3 = vld [vmem:[#allocation8 + $0x10c] ss:$16 sps:$4 sm:$0xff]  }
  0x8b   :  { %1478 = vmatpush2.bf16.msra.mxu1 %v5685_v4  ;;  %1488 = vmatprep.subr.bf16.mxu0 %v5692_v5  ;;  %v5785_v4 = vld [vmem:[#allocation8 + $0x30c] ss:$16 sps:$4 sm:$0xff]   ;;  %v5780_v5 = vld [vmem:[#allocation8 + $0x108] ss:$16 sps:$4 sm:$0xff]  }
  0x8c   :  { %1529 = vmatprep.subr.bf16.mxu1 %v5695_v6  ;;  %v5783_v6 = vld [vmem:[#allocation8 + $0x308] ss:$16 sps:$4 sm:$0xff]  }
  0x8d   :  { %1439 = vmatmul.mubr.bf16.vlgmr.msra.gmra.mxu0 %v6770_v7 }
  0x8e   :  { %1480 = vmatmul.mubr.bf16.vlgmr.msra.gmra.mxu1 %v6772_v8  ;;  %1489 = vmatpush1.bf16.msra.mxu0 %v5690_v9  ;;  %v5788_v9 = vld [vmem:[#allocation7 + $0xe4] ss:$16 sps:$4 sm:$0xff]  }
  0x8f   :  { %1530 = vmatpush1.bf16.msra.mxu1 %v5693_v10  ;;  %1490 = vmatprep.subr.bf16.mxu0 %v5698_v11  ;;  %v5791_v10 = vld [vmem:[#allocation7 + $0x2e4] ss:$16 sps:$4 sm:$0xff]   ;;  %v5786_v11 = vld [vmem:[#allocation7 + $0xe0] ss:$16 sps:$4 sm:$0xff]  }
  0x90   :  { %1531 = vmatprep.subr.bf16.mxu1 %v5701_v12  ;;  %1520 = vmatprep.mubr.bf16.mxu0 %v6767_v48  ;;  %v5755_v48 = vld [vmem:[#allocation8 + $0x3ac] ss:$16 sps:$4 sm:$0xff]   ;;  %v5789_v12 = vld [vmem:[#allocation7 + $0x2e0] ss:$16 sps:$4 sm:$0xff]  }
  0x91   :  { %1561 = vmatprep.mubr.bf16.mxu1 %v4924_v52  ;;  %v5761_v52 = vld [vmem:[#allocation8 + $0x38c] ss:$16 sps:$4 sm:$0xff]  }
  0x92   :  { %1491 = vmatpush1.bf16.msra.mxu0 %v5696_v13  ;;  %v5794_v13 = vld [vmem:[#allocation7 + $0xc4] ss:$16 sps:$4 sm:$0xff]  }
  0x93   :  { %1532 = vmatpush1.bf16.msra.mxu1 %v5699_v14  ;;  %1492 = vmatprep.subr.bf16.mxu0 %v5704_v15  ;;  %v5797_v14 = vld [vmem:[#allocation7 + $0x2c4] ss:$16 sps:$4 sm:$0xff]  }
  0x94   :  { %1533 = vmatprep.subr.bf16.mxu1 %v5707_v16  ;;  %v6777_v15 = vld [vmem:[#allocation3] sm:$0xff]  ;;  %v6779_v16 = vld [vmem:[#allocation3 + $0x8] sm:$0xff] }
  0x96   :  { %1493 = vmatpush1.bf16.msra.mxu0 %v5702_v17  ;;  %v6783_v17 = vcombine.high %v6777_v15, %v6777_v15 }
  0x97   :  { %1534 = vmatpush1.bf16.msra.mxu1 %v5705_v18  ;;  %1494 = vmatprep.subr.bf16.mxu0 %v5710_v19  ;;  %v6787_v18 = vcombine.high %v6779_v16, %v6779_v16  ;;  %v5792_v19 = vld [vmem:[#allocation7 + $0xc0] ss:$16 sps:$4 sm:$0xff]  }
  0x98   :  { %1535 = vmatprep.subr.bf16.mxu1 %v5713_v20  ;;  %v5795_v20 = vld [vmem:[#allocation7 + $0x2c0] ss:$16 sps:$4 sm:$0xff]  }
  0x9a   :  { %1495 = vmatpush1.bf16.msra.mxu0 %v5708_v21  ;;  %v5800_v21 = vld [vmem:[#allocation7 + $0xa4] ss:$16 sps:$4 sm:$0xff]  }
  0x9b   :  { %1536 = vmatpush1.bf16.msra.mxu1 %v5711_v22  ;;  %1496 = vmatprep.subr.bf16.mxu0 %v5716_v23  ;;  %v5803_v22 = vld [vmem:[#allocation7 + $0x2a4] ss:$16 sps:$4 sm:$0xff]   ;;  %v5798_v23 = vld [vmem:[#allocation7 + $0xa0] ss:$16 sps:$4 sm:$0xff]  }
  0x9c   :  { %1537 = vmatprep.subr.bf16.mxu1 %v5719_v24  ;;  %v5801_v24 = vld [vmem:[#allocation7 + $0x2a0] ss:$16 sps:$4 sm:$0xff]  }
  0x9e   :  { %1497 = vmatpush1.bf16.msra.mxu0 %v5714_v25  ;;  %v5806_v25 = vld [vmem:[#allocation7 + $0x84] ss:$16 sps:$4 sm:$0xff]  }
  0x9f   :  { %1538 = vmatpush1.bf16.msra.mxu1 %v5717_v26  ;;  %1498 = vmatprep.subr.bf16.mxu0 %v5722_v27  ;;  %v5807_v26 = vld [vmem:[#allocation7 + $0x280] ss:$16 sps:$4 sm:$0xff]   ;;  %v5812_v27 = vld [vmem:[#allocation7 + $0x64] ss:$16 sps:$4 sm:$0xff]  }
  0xa0   :  { %1539 = vmatprep.subr.bf16.mxu1 %v5725_v28  ;;  %v5815_v28 = vld [vmem:[#allocation7 + $0x264] ss:$16 sps:$4 sm:$0xff]  }
  0xa2   :  { %1499 = vmatpush1.bf16.msra.mxu0 %v5720_v29  ;;  %v5810_v29 = vld [vmem:[#allocation7 + $0x60] ss:$16 sps:$4 sm:$0xff]  }
  0xa3   :  { %1540 = vmatpush1.bf16.msra.mxu1 %v5723_v30  ;;  %1500 = vmatprep.subr.bf16.mxu0 %v5728_v31  ;;  %v5813_v30 = vld [vmem:[#allocation7 + $0x260] ss:$16 sps:$4 sm:$0xff]   ;;  %v5818_v31 = vld [vmem:[#allocation7 + $0x44] ss:$16 sps:$4 sm:$0xff]  }
  0xa4   :  { %1541 = vmatprep.subr.bf16.mxu1 %v5731_v32  ;;  %v5821_v32 = vld [vmem:[#allocation7 + $0x244] ss:$16 sps:$4 sm:$0xff]  }
  0xa6   :  { %1501 = vmatpush1.bf16.msra.mxu0 %v5726_v33  ;;  %v5816_v33 = vld [vmem:[#allocation7 + $0x40] ss:$16 sps:$4 sm:$0xff]  }
  0xa7   :  { %1542 = vmatpush1.bf16.msra.mxu1 %v5729_v34  ;;  %1502 = vmatprep.subr.bf16.mxu0 %v5734_v35  ;;  %v5819_v34 = vld [vmem:[#allocation7 + $0x240] ss:$16 sps:$4 sm:$0xff]   ;;  %v5824_v35 = vld [vmem:[#allocation7 + $0x24] ss:$16 sps:$4 sm:$0xff]  }
  0xa8   :  { %1543 = vmatprep.subr.bf16.mxu1 %v5737_v36  ;;  %v5827_v36 = vld [vmem:[#allocation7 + $0x224] ss:$16 sps:$4 sm:$0xff]  }
  0xaa   :  { %1503 = vmatpush1.bf16.msra.mxu0 %v5732_v37  ;;  %v5822_v37 = vld [vmem:[#allocation7 + $0x20] ss:$16 sps:$4 sm:$0xff]  }
  0xab   :  { %1544 = vmatpush1.bf16.msra.mxu1 %v5735_v38  ;;  %1504 = vmatprep.subr.bf16.mxu0 %v5740_v39  ;;  %v5825_v38 = vld [vmem:[#allocation7 + $0x220] ss:$16 sps:$4 sm:$0xff]   ;;  %v5830_v39 = vld [vmem:[#allocation7 + $0x4] ss:$16 sps:$4 sm:$0xff]  }
  0xac   :  { %1545 = vmatprep.subr.bf16.mxu1 %v5743_v40  ;;  %v5833_v40 = vld [vmem:[#allocation7 + $0x204] ss:$16 sps:$4 sm:$0xff]  }
  0xae   :  { %1505 = vmatpush2.bf16.msra.mxu0 %v5738_v41  ;;  %v5828_v41 = vld [vmem:[#allocation7] ss:$16 sps:$4 sm:$0xff]  }
  0xaf   :  { %1546 = vmatpush2.bf16.msra.mxu1 %v5741_v42  ;;  %1506 = vmatprep.subr.bf16.mxu0 %v5746_v43  ;;  %v5831_v42 = vld [vmem:[#allocation7 + $0x200] ss:$16 sps:$4 sm:$0xff]   ;;  %v5836_v43 = vld [vmem:[#allocation7 + $0x1e4] ss:$16 sps:$4 sm:$0xff]  }
  0xb0   :  { %1547 = vmatprep.subr.bf16.mxu1 %v5749_v44  ;;  %v5839_v44 = vld [vmem:[#allocation7 + $0x3e4] ss:$16 sps:$4 sm:$0xff]  }
  0xb2   :  { %1507 = vmatpush2.bf16.msra.mxu0 %v5744_v45  ;;  %v5834_v45 = vld [vmem:[#allocation7 + $0x1e0] ss:$16 sps:$4 sm:$0xff]  }
  0xb3   :  { %1548 = vmatpush2.bf16.msra.mxu1 %v5747_v46  ;;  %1508 = vmatprep.subr.bf16.mxu0 %v5752_v47  ;;  %v5837_v46 = vld [vmem:[#allocation7 + $0x3e0] ss:$16 sps:$4 sm:$0xff]   ;;  %v5842_v47 = vld [vmem:[#allocation7 + $0x1c4] ss:$16 sps:$4 sm:$0xff]  }
  0xb4   :  { %1549 = vmatprep.subr.bf16.mxu1 %v5755_v48  ;;  %v5845_v48 = vld [vmem:[#allocation7 + $0x3c4] ss:$16 sps:$4 sm:$0xff]  }
  0xb6   :  { %1509 = vmatpush2.bf16.msra.mxu0 %v5750_v49  ;;  %v5840_v49 = vld [vmem:[#allocation7 + $0x1c0] ss:$16 sps:$4 sm:$0xff]  }
  0xb7   :  { %1550 = vmatpush2.bf16.msra.mxu1 %v5753_v50  ;;  %1510 = vmatprep.subr.bf16.mxu0 %v5758_v51  ;;  %v5843_v50 = vld [vmem:[#allocation7 + $0x3c0] ss:$16 sps:$4 sm:$0xff]   ;;  %v5848_v51 = vld [vmem:[#allocation7 + $0x1a4] ss:$16 sps:$4 sm:$0xff]  }
  0xb8   :  { %1551 = vmatprep.subr.bf16.mxu1 %v5761_v52  ;;  %v5851_v52 = vld [vmem:[#allocation7 + $0x3a4] ss:$16 sps:$4 sm:$0xff]  }
  0xba   :  { %1511 = vmatpush2.bf16.msra.mxu0 %v5756_v53  ;;  %v5846_v53 = vld [vmem:[#allocation7 + $0x1a0] ss:$16 sps:$4 sm:$0xff]  }
  0xbb   :  { %1552 = vmatpush2.bf16.msra.mxu1 %v5759_v54  ;;  %1512 = vmatprep.subr.bf16.mxu0 %v5764_v55  ;;  %v5849_v54 = vld [vmem:[#allocation7 + $0x3a0] ss:$16 sps:$4 sm:$0xff]   ;;  %v5854_v55 = vld [vmem:[#allocation7 + $0x184] ss:$16 sps:$4 sm:$0xff]  }
  0xbc   :  { %1553 = vmatprep.subr.bf16.mxu1 %v5767_v56  ;;  %v5857_v56 = vld [vmem:[#allocation7 + $0x384] ss:$16 sps:$4 sm:$0xff]  }
  0xbe   :  { %1513 = vmatpush2.bf16.msra.mxu0 %v5762_v57  ;;  %v5852_v57 = vld [vmem:[#allocation7 + $0x180] ss:$16 sps:$4 sm:$0xff]  }
  0xbf   :  { %1554 = vmatpush2.bf16.msra.mxu1 %v5765_v58  ;;  %1514 = vmatprep.subr.bf16.mxu0 %v5770_v59  ;;  %v5855_v58 = vld [vmem:[#allocation7 + $0x380] ss:$16 sps:$4 sm:$0xff]   ;;  %v5860_v59 = vld [vmem:[#allocation7 + $0x164] ss:$16 sps:$4 sm:$0xff]  }
  0xc0   :  { %1555 = vmatprep.subr.bf16.mxu1 %v5773_v60  ;;  %v5863_v60 = vld [vmem:[#allocation7 + $0x364] ss:$16 sps:$4 sm:$0xff]  }
  0xc2   :  { %1515 = vmatpush2.bf16.msra.mxu0 %v5768_v61  ;;  %v5858_v61 = vld [vmem:[#allocation7 + $0x160] ss:$16 sps:$4 sm:$0xff]  }
  0xc3   :  { %1556 = vmatpush2.bf16.msra.mxu1 %v5771_v62  ;;  %1516 = vmatprep.subr.bf16.mxu0 %v5776_v63  ;;  %v5861_v62 = vld [vmem:[#allocation7 + $0x360] ss:$16 sps:$4 sm:$0xff]   ;;  %v5866_v63 = vld [vmem:[#allocation7 + $0x144] ss:$16 sps:$4 sm:$0xff]  }
  0xc4   :  { %1557 = vmatprep.subr.bf16.mxu1 %v5779_v0  ;;  %v5869_v0 = vld [vmem:[#allocation7 + $0x344] ss:$16 sps:$4 sm:$0xff]  }
  0xc6   :  { %1517 = vmatpush2.bf16.msra.mxu0 %v5774_v1  ;;  %v5864_v1 = vld [vmem:[#allocation7 + $0x140] ss:$16 sps:$4 sm:$0xff]  }
  0xc7   :  { %1558 = vmatpush2.bf16.msra.mxu1 %v5777_v2  ;;  %1518 = vmatprep.subr.bf16.mxu0 %v5782_v3  ;;  %v5867_v2 = vld [vmem:[#allocation7 + $0x340] ss:$16 sps:$4 sm:$0xff]   ;;  %v5872_v3 = vld [vmem:[#allocation7 + $0x124] ss:$16 sps:$4 sm:$0xff]  }
  0xc8   :  { %1559 = vmatprep.subr.bf16.mxu1 %v5785_v4  ;;  %v5875_v4 = vld [vmem:[#allocation7 + $0x324] ss:$16 sps:$4 sm:$0xff]  }
  0xca   :  { %1519 = vmatpush2.bf16.msra.mxu0 %v5780_v5  ;;  %v5870_v5 = vld [vmem:[#allocation7 + $0x120] ss:$16 sps:$4 sm:$0xff]  }
  0xcb   :  { %1560 = vmatpush2.bf16.msra.mxu1 %v5783_v6  ;;  %4186 = vmatprep.subr.bf16.mxu0 %v5788_v9  ;;  %v5873_v6 = vld [vmem:[#allocation7 + $0x320] ss:$16 sps:$4 sm:$0xff]   ;;  %v5878_v9 = vld [vmem:[#allocation7 + $0x104] ss:$16 sps:$4 sm:$0xff]  }
  0xcc   :  { %4227 = vmatprep.subr.bf16.mxu1 %v5791_v10  ;;  %v5881_v10 = vld [vmem:[#allocation7 + $0x304] ss:$16 sps:$4 sm:$0xff]  }
  0xcd   :  { %1521 = vmatmul.mubr.bf16.vlgmr.msra.gmra.mxu0 %v6770_v7  ;;  %v5809_v7 = vld [vmem:[#allocation7 + $0x284] ss:$16 sps:$4 sm:$0xff]  }
  0xce   :  { %1562 = vmatmul.mubr.bf16.vlgmr.msra.gmra.mxu1 %v6772_v8  ;;  %4187 = vmatpush1.bf16.msra.mxu0 %v5786_v11  ;;  %v5804_v8 = vld [vmem:[#allocation7 + $0x80] ss:$16 sps:$4 sm:$0xff]  }
  0xcf   :  { %4228 = vmatpush1.bf16.msra.mxu1 %v5789_v12  ;;  %4188 = vmatprep.subr.bf16.mxu0 %v5794_v13  ;;  %v5876_v11 = vld [vmem:[#allocation7 + $0x100] ss:$16 sps:$4 sm:$0xff]   ;;  %v5888_v13 = vld [vmem:[#allocation7 + $0x4e4] ss:$16 sps:$4 sm:$0xff]  }
  0xd0   :  { %4229 = vmatprep.subr.bf16.mxu1 %v5797_v14  ;;  %4218 = vmatprep.mubr.bf16.mxu0 %v6783_v17  ;;  %v5879_v12 = vld [vmem:[#allocation7 + $0x300] ss:$16 sps:$4 sm:$0xff]   ;;  %v5891_v14 = vld [vmem:[#allocation7 + $0x6e4] ss:$16 sps:$4 sm:$0xff]  }
  0xd1   :  { %4259 = vmatprep.mubr.bf16.mxu1 %v6787_v18 }
  0xd2   :  { %4189 = vmatpush1.bf16.msra.mxu0 %v5792_v19  ;;  %v6793_v19 = vld [vmem:[#allocation3 + $0x10] sm:$0xff] }
  0xd3   :  { %4230 = vmatpush1.bf16.msra.mxu1 %v5795_v20  ;;  %4190 = vmatprep.subr.bf16.mxu0 %v5800_v21  ;;  %v6797_v20 = vcombine.low %v6777_v15, %v6777_v15  ;;  %v6801_v21 = vcombine.low %v6779_v16, %v6779_v16  ;;  %v5892_v16 = vld [vmem:[#allocation7 + $0x4c0] ss:$16 sps:$4 sm:$0xff]  }
  0xd4   :  { %4231 = vmatprep.subr.bf16.mxu1 %v5803_v22  ;;  %v6803_v22 = vld [vmem:[#allocation3 + $0x18] sm:$0xff] }
  0xd5   :  { %v6811_v15 = vcombine.high %v6803_v22, %v6803_v22 }
  0xd6   :  { %4191 = vmatpush1.bf16.msra.mxu0 %v5798_v23  ;;  %v5886_v23 = vld [vmem:[#allocation7 + $0x4e0] ss:$16 sps:$4 sm:$0xff]  }
  0xd7   :  { %4232 = vmatpush1.bf16.msra.mxu1 %v5801_v24  ;;  %4192 = vmatprep.subr.bf16.mxu0 %v5806_v25  ;;  %v5889_v24 = vld [vmem:[#allocation7 + $0x6e0] ss:$16 sps:$4 sm:$0xff]   ;;  %v5894_v25 = vld [vmem:[#allocation7 + $0x4c4] ss:$16 sps:$4 sm:$0xff]  }
  0xd8   :  { %4233 = vmatprep.subr.bf16.mxu1 %v5809_v7  ;;  %v5897_v7 = vld [vmem:[#allocation7 + $0x6c4] ss:$16 sps:$4 sm:$0xff]  }
  0xda   :  { %4193 = vmatpush1.bf16.msra.mxu0 %v5804_v8  ;;  %v6807_v8 = vcombine.high %v6793_v19, %v6793_v19 }
  0xdb   :  { %4234 = vmatpush1.bf16.msra.mxu1 %v5807_v26  ;;  %4194 = vmatprep.subr.bf16.mxu0 %v5812_v27  ;;  %v5895_v26 = vld [vmem:[#allocation7 + $0x6c0] ss:$16 sps:$4 sm:$0xff]   ;;  %v5900_v27 = vld [vmem:[#allocation7 + $0x4a4] ss:$16 sps:$4 sm:$0xff]  }
  0xdc   :  { %4235 = vmatprep.subr.bf16.mxu1 %v5815_v28  ;;  %v5903_v28 = vld [vmem:[#allocation7 + $0x6a4] ss:$16 sps:$4 sm:$0xff]  }
  0xde   :  { %4195 = vmatpush1.bf16.msra.mxu0 %v5810_v29  ;;  %v5898_v29 = vld [vmem:[#allocation7 + $0x4a0] ss:$16 sps:$4 sm:$0xff]  }
  0xdf   :  { %4236 = vmatpush1.bf16.msra.mxu1 %v5813_v30  ;;  %4196 = vmatprep.subr.bf16.mxu0 %v5818_v31  ;;  %v5901_v30 = vld [vmem:[#allocation7 + $0x6a0] ss:$16 sps:$4 sm:$0xff]   ;;  %v5906_v31 = vld [vmem:[#allocation7 + $0x484] ss:$16 sps:$4 sm:$0xff]  }
  0xe0   :  { %4237 = vmatprep.subr.bf16.mxu1 %v5821_v32  ;;  %v5909_v32 = vld [vmem:[#allocation7 + $0x684] ss:$16 sps:$4 sm:$0xff]  }
  0xe2   :  { %4197 = vmatpush1.bf16.msra.mxu0 %v5816_v33  ;;  %v5904_v33 = vld [vmem:[#allocation7 + $0x480] ss:$16 sps:$4 sm:$0xff]  }
  0xe3   :  { %4238 = vmatpush1.bf16.msra.mxu1 %v5819_v34  ;;  %4198 = vmatprep.subr.bf16.mxu0 %v5824_v35  ;;  %v5907_v34 = vld [vmem:[#allocation7 + $0x680] ss:$16 sps:$4 sm:$0xff]   ;;  %v5912_v35 = vld [vmem:[#allocation7 + $0x464] ss:$16 sps:$4 sm:$0xff]  }
  0xe4   :  { %4239 = vmatprep.subr.bf16.mxu1 %v5827_v36  ;;  %v5915_v36 = vld [vmem:[#allocation7 + $0x664] ss:$16 sps:$4 sm:$0xff]  }
  0xe6   :  { %4199 = vmatpush1.bf16.msra.mxu0 %v5822_v37  ;;  %v5910_v37 = vld [vmem:[#allocation7 + $0x460] ss:$16 sps:$4 sm:$0xff]  }
  0xe7   :  { %4240 = vmatpush1.bf16.msra.mxu1 %v5825_v38  ;;  %4200 = vmatprep.subr.bf16.mxu0 %v5830_v39  ;;  %v5913_v38 = vld [vmem:[#allocation7 + $0x660] ss:$16 sps:$4 sm:$0xff]   ;;  %v5918_v39 = vld [vmem:[#allocation7 + $0x444] ss:$16 sps:$4 sm:$0xff]  }
  0xe8   :  { %4241 = vmatprep.subr.bf16.mxu1 %v5833_v40  ;;  %v5921_v40 = vld [vmem:[#allocation7 + $0x644] ss:$16 sps:$4 sm:$0xff]  }
  0xea   :  { %4201 = vmatpush1.bf16.msra.mxu0 %v5828_v41  ;;  %v5916_v41 = vld [vmem:[#allocation7 + $0x440] ss:$16 sps:$4 sm:$0xff]  }
  0xeb   :  { %4242 = vmatpush1.bf16.msra.mxu1 %v5831_v42  ;;  %4202 = vmatprep.subr.bf16.mxu0 %v5836_v43  ;;  %v5919_v42 = vld [vmem:[#allocation7 + $0x640] ss:$16 sps:$4 sm:$0xff]   ;;  %v5924_v43 = vld [vmem:[#allocation7 + $0x424] ss:$16 sps:$4 sm:$0xff]  }
  0xec   :  { %4243 = vmatprep.subr.bf16.mxu1 %v5839_v44  ;;  %v5927_v44 = vld [vmem:[#allocation7 + $0x624] ss:$16 sps:$4 sm:$0xff]  }
  0xee   :  { %4203 = vmatpush2.bf16.msra.mxu0 %v5834_v45  ;;  %v5922_v45 = vld [vmem:[#allocation7 + $0x420] ss:$16 sps:$4 sm:$0xff]  }
  0xef   :  { %4244 = vmatpush2.bf16.msra.mxu1 %v5837_v46  ;;  %4204 = vmatprep.subr.bf16.mxu0 %v5842_v47  ;;  %v5925_v46 = vld [vmem:[#allocation7 + $0x620] ss:$16 sps:$4 sm:$0xff]   ;;  %v5930_v47 = vld [vmem:[#allocation7 + $0x404] ss:$16 sps:$4 sm:$0xff]  }
  0xf0   :  { %4245 = vmatprep.subr.bf16.mxu1 %v5845_v48  ;;  %v5933_v48 = vld [vmem:[#allocation7 + $0x604] ss:$16 sps:$4 sm:$0xff]  }
  0xf2   :  { %4205 = vmatpush2.bf16.msra.mxu0 %v5840_v49  ;;  %v5928_v49 = vld [vmem:[#allocation7 + $0x400] ss:$16 sps:$4 sm:$0xff]  }
  0xf3   :  { %4246 = vmatpush2.bf16.msra.mxu1 %v5843_v50  ;;  %4206 = vmatprep.subr.bf16.mxu0 %v5848_v51  ;;  %v5931_v50 = vld [vmem:[#allocation7 + $0x600] ss:$16 sps:$4 sm:$0xff]   ;;  %v5936_v51 = vld [vmem:[#allocation7 + $0x5e4] ss:$16 sps:$4 sm:$0xff]  }
  0xf4   :  { %4247 = vmatprep.subr.bf16.mxu1 %v5851_v52  ;;  %v5939_v52 = vld [vmem:[#allocation7 + $0x7e4] ss:$16 sps:$4 sm:$0xff]  }
  0xf6   :  { %4207 = vmatpush2.bf16.msra.mxu0 %v5846_v53  ;;  %v5934_v53 = vld [vmem:[#allocation7 + $0x5e0] ss:$16 sps:$4 sm:$0xff]  }
  0xf7   :  { %4248 = vmatpush2.bf16.msra.mxu1 %v5849_v54  ;;  %4208 = vmatprep.subr.bf16.mxu0 %v5854_v55  ;;  %v5937_v54 = vld [vmem:[#allocation7 + $0x7e0] ss:$16 sps:$4 sm:$0xff]   ;;  %v5942_v55 = vld [vmem:[#allocation7 + $0x5c4] ss:$16 sps:$4 sm:$0xff]  }
  0xf8   :  { %4249 = vmatprep.subr.bf16.mxu1 %v5857_v56  ;;  %v5945_v56 = vld [vmem:[#allocation7 + $0x7c4] ss:$16 sps:$4 sm:$0xff]  }
  0xfa   :  { %4209 = vmatpush2.bf16.msra.mxu0 %v5852_v57  ;;  %v5940_v57 = vld [vmem:[#allocation7 + $0x5c0] ss:$16 sps:$4 sm:$0xff]  }
  0xfb   :  { %4250 = vmatpush2.bf16.msra.mxu1 %v5855_v58  ;;  %4210 = vmatprep.subr.bf16.mxu0 %v5860_v59  ;;  %v5943_v58 = vld [vmem:[#allocation7 + $0x7c0] ss:$16 sps:$4 sm:$0xff]   ;;  %v5948_v59 = vld [vmem:[#allocation7 + $0x5a4] ss:$16 sps:$4 sm:$0xff]  }
  0xfc   :  { %4251 = vmatprep.subr.bf16.mxu1 %v5863_v60  ;;  %v5951_v60 = vld [vmem:[#allocation7 + $0x7a4] ss:$16 sps:$4 sm:$0xff]  }
  0xfe   :  { %4211 = vmatpush2.bf16.msra.mxu0 %v5858_v61  ;;  %v5946_v61 = vld [vmem:[#allocation7 + $0x5a0] ss:$16 sps:$4 sm:$0xff]  }
  0xff   :  { %4252 = vmatpush2.bf16.msra.mxu1 %v5861_v62  ;;  %4212 = vmatprep.subr.bf16.mxu0 %v5866_v63  ;;  %v5949_v62 = vld [vmem:[#allocation7 + $0x7a0] ss:$16 sps:$4 sm:$0xff]   ;;  %v5954_v63 = vld [vmem:[#allocation7 + $0x584] ss:$16 sps:$4 sm:$0xff]  }
 0x100   :  { %4253 = vmatprep.subr.bf16.mxu1 %v5869_v0  ;;  %v5957_v0 = vld [vmem:[#allocation7 + $0x784] ss:$16 sps:$4 sm:$0xff]  }
 0x102   :  { %4213 = vmatpush2.bf16.msra.mxu0 %v5864_v1  ;;  %v5952_v1 = vld [vmem:[#allocation7 + $0x580] ss:$16 sps:$4 sm:$0xff]  }
 0x103   :  { %4254 = vmatpush2.bf16.msra.mxu1 %v5867_v2  ;;  %4214 = vmatprep.subr.bf16.mxu0 %v5872_v3  ;;  %v5955_v2 = vld [vmem:[#allocation7 + $0x780] ss:$16 sps:$4 sm:$0xff]   ;;  %v5960_v3 = vld [vmem:[#allocation7 + $0x564] ss:$16 sps:$4 sm:$0xff]  }
 0x104   :  { %4255 = vmatprep.subr.bf16.mxu1 %v5875_v4  ;;  %v5963_v4 = vld [vmem:[#allocation7 + $0x764] ss:$16 sps:$4 sm:$0xff]  }
 0x106   :  { %4215 = vmatpush2.bf16.msra.mxu0 %v5870_v5  ;;  %v5958_v5 = vld [vmem:[#allocation7 + $0x560] ss:$16 sps:$4 sm:$0xff]  }
 0x107   :  { %4256 = vmatpush2.bf16.msra.mxu1 %v5873_v6  ;;  %4216 = vmatprep.subr.bf16.mxu0 %v5878_v9  ;;  %v5961_v6 = vld [vmem:[#allocation7 + $0x760] ss:$16 sps:$4 sm:$0xff]   ;;  %v5966_v9 = vld [vmem:[#allocation7 + $0x544] ss:$16 sps:$4 sm:$0xff]  }
 0x108   :  { %4257 = vmatprep.subr.bf16.mxu1 %v5881_v10  ;;  %v5969_v10 = vld [vmem:[#allocation7 + $0x744] ss:$16 sps:$4 sm:$0xff]  }
 0x10a   :  { %4217 = vmatpush2.bf16.msra.mxu0 %v5876_v11  ;;  %v5964_v11 = vld [vmem:[#allocation7 + $0x540] ss:$16 sps:$4 sm:$0xff]  }
 0x10b   :  { %4258 = vmatpush2.bf16.msra.mxu1 %v5879_v12  ;;  %4268 = vmatprep.subr.bf16.mxu0 %v5888_v13  ;;  %v5967_v12 = vld [vmem:[#allocation7 + $0x740] ss:$16 sps:$4 sm:$0xff]   ;;  %v5972_v13 = vld [vmem:[#allocation7 + $0x524] ss:$16 sps:$4 sm:$0xff]  }
 0x10c   :  { %4309 = vmatprep.subr.bf16.mxu1 %v5891_v14  ;;  %v5975_v14 = vld [vmem:[#allocation7 + $0x724] ss:$16 sps:$4 sm:$0xff]  }
 0x10d   :  { %4219 = vmatmul.mubr.bf16.vlgmr.msra.gmra.mxu0 %v6797_v20 }
 0x10e   :  { %4260 = vmatmul.mubr.bf16.vlgmr.msra.gmra.mxu1 %v6801_v21  ;;  %4269 = vmatpush1.bf16.msra.mxu0 %v5886_v23  ;;  %v5970_v23 = vld [vmem:[#allocation7 + $0x520] ss:$16 sps:$4 sm:$0xff]  }
 0x10f   :  { %4310 = vmatpush1.bf16.msra.mxu1 %v5889_v24  ;;  %4270 = vmatprep.subr.bf16.mxu0 %v5894_v25  ;;  %v5973_v24 = vld [vmem:[#allocation7 + $0x720] ss:$16 sps:$4 sm:$0xff]   ;;  %v5978_v25 = vld [vmem:[#allocation7 + $0x504] ss:$16 sps:$4 sm:$0xff]  }
 0x110   :  { %4311 = vmatprep.subr.bf16.mxu1 %v5897_v7  ;;  %4300 = vmatprep.mubr.bf16.mxu0 %v6807_v8  ;;  %v5981_v7 = vld [vmem:[#allocation7 + $0x704] ss:$16 sps:$4 sm:$0xff]  }
 0x111   :  { %4341 = vmatprep.mubr.bf16.mxu1 %v6811_v15 }
 0x112   :  { %4271 = vmatpush1.bf16.msra.mxu0 %v5892_v16  ;;  %v5976_v16 = vld [vmem:[#allocation7 + $0x500] ss:$16 sps:$4 sm:$0xff]  }
 0x113   :  { %4312 = vmatpush1.bf16.msra.mxu1 %v5895_v26  ;;  %4272 = vmatprep.subr.bf16.mxu0 %v5900_v27  ;;  %v5979_v26 = vld [vmem:[#allocation7 + $0x700] ss:$16 sps:$4 sm:$0xff]   ;;  %v5988_v27 = vld [vmem:[#allocation7 + $0x8e4] ss:$16 sps:$4 sm:$0xff]  }
 0x114   :  { %4313 = vmatprep.subr.bf16.mxu1 %v5903_v28  ;;  %v5991_v28 = vld [vmem:[#allocation7 + $0xae4] ss:$16 sps:$4 sm:$0xff]  }
 0x116   :  { %4273 = vmatpush1.bf16.msra.mxu0 %v5898_v29  ;;  %v5986_v29 = vld [vmem:[#allocation7 + $0x8e0] ss:$16 sps:$4 sm:$0xff]  }
 0x117   :  { %4314 = vmatpush1.bf16.msra.mxu1 %v5901_v30  ;;  %4274 = vmatprep.subr.bf16.mxu0 %v5906_v31  ;;  %v5989_v30 = vld [vmem:[#allocation7 + $0xae0] ss:$16 sps:$4 sm:$0xff]   ;;  %v6819_v31 = vcombine.low %v6793_v19, %v6793_v19 }
 0x118   :  { %4315 = vmatprep.subr.bf16.mxu1 %v5909_v32  ;;  %v6823_v32 = vcombine.low %v6803_v22, %v6803_v22 }
 0x11a   :  { %4275 = vmatpush1.bf16.msra.mxu0 %v5904_v33  ;;  %v6825_v33 = vld [vmem:[#allocation3 + $0x20] sm:$0xff] }
 0x11b   :  { %4316 = vmatpush1.bf16.msra.mxu1 %v5907_v34  ;;  %4276 = vmatprep.subr.bf16.mxu0 %v5912_v35  ;;  %v6827_v34 = vld [vmem:[#allocation3 + $0x28] sm:$0xff]  ;;  %v5994_v35 = vld [vmem:[#allocation7 + $0x8c4] ss:$16 sps:$4 sm:$0xff]  }
 0x11c   :  { %4317 = vmatprep.subr.bf16.mxu1 %v5915_v36  ;;  %v5997_v36 = vld [vmem:[#allocation7 + $0xac4] ss:$16 sps:$4 sm:$0xff]   ;;  %v6835_v19 = vcombine.high %v6827_v34, %v6827_v34 }
 0x11e   :  { %4277 = vmatpush1.bf16.msra.mxu0 %v5910_v37  ;;  %v6831_v37 = vcombine.high %v6825_v33, %v6825_v33 }
 0x11f   :  { %4318 = vmatpush1.bf16.msra.mxu1 %v5913_v38  ;;  %4278 = vmatprep.subr.bf16.mxu0 %v5918_v39 }
 0x120   :  { %4319 = vmatprep.subr.bf16.mxu1 %v5921_v40  ;;  %v5992_v40 = vld [vmem:[#allocation7 + $0x8c0] ss:$16 sps:$4 sm:$0xff]  }
 0x122   :  { %4279 = vmatpush1.bf16.msra.mxu0 %v5916_v41  ;;  %v5995_v41 = vld [vmem:[#allocation7 + $0xac0] ss:$16 sps:$4 sm:$0xff]  }
 0x123   :  { %4320 = vmatpush1.bf16.msra.mxu1 %v5919_v42  ;;  %4280 = vmatprep.subr.bf16.mxu0 %v5924_v43 }
 0x124   :  { %4321 = vmatprep.subr.bf16.mxu1 %v5927_v44  ;;  %v6000_v44 = vld [vmem:[#allocation7 + $0x8a4] ss:$16 sps:$4 sm:$0xff]  }
 0x126   :  { %4281 = vmatpush1.bf16.msra.mxu0 %v5922_v45  ;;  %v6003_v45 = vld [vmem:[#allocation7 + $0xaa4] ss:$16 sps:$4 sm:$0xff]  }
 0x127   :  { %4322 = vmatpush1.bf16.msra.mxu1 %v5925_v46  ;;  %4282 = vmatprep.subr.bf16.mxu0 %v5930_v47 }
 0x128   :  { %4323 = vmatprep.subr.bf16.mxu1 %v5933_v48 }
 0x12a   :  { %4283 = vmatpush1.bf16.msra.mxu0 %v5928_v49  ;;  %v5998_v49 = vld [vmem:[#allocation7 + $0x8a0] ss:$16 sps:$4 sm:$0xff]  }
 0x12b   :  { %4324 = vmatpush1.bf16.msra.mxu1 %v5931_v50  ;;  %4284 = vmatprep.subr.bf16.mxu0 %v5936_v51  ;;  %v6001_v50 = vld [vmem:[#allocation7 + $0xaa0] ss:$16 sps:$4 sm:$0xff]  }
 0x12c   :  { %4325 = vmatprep.subr.bf16.mxu1 %v5939_v52 }
 0x12e   :  { %4285 = vmatpush2.bf16.msra.mxu0 %v5934_v53  ;;  %v6006_v53 = vld [vmem:[#allocation7 + $0x884] ss:$16 sps:$4 sm:$0xff]  }
 0x12f   :  { %4326 = vmatpush2.bf16.msra.mxu1 %v5937_v54  ;;  %4286 = vmatprep.subr.bf16.mxu0 %v5942_v55  ;;  %v6009_v54 = vld [vmem:[#allocation7 + $0xa84] ss:$16 sps:$4 sm:$0xff]   ;;  %v6004_v55 = vld [vmem:[#allocation7 + $0x880] ss:$16 sps:$4 sm:$0xff]  }
 0x130   :  { %4327 = vmatprep.subr.bf16.mxu1 %v5945_v56  ;;  %v6007_v56 = vld [vmem:[#allocation7 + $0xa80] ss:$16 sps:$4 sm:$0xff]  }
 0x132   :  { %4287 = vmatpush2.bf16.msra.mxu0 %v5940_v57  ;;  %v6012_v57 = vld [vmem:[#allocation7 + $0x864] ss:$16 sps:$4 sm:$0xff]  }
 0x133   :  { %4328 = vmatpush2.bf16.msra.mxu1 %v5943_v58  ;;  %4288 = vmatprep.subr.bf16.mxu0 %v5948_v59  ;;  %v6015_v58 = vld [vmem:[#allocation7 + $0xa64] ss:$16 sps:$4 sm:$0xff]   ;;  %v6010_v59 = vld [vmem:[#allocation7 + $0x860] ss:$16 sps:$4 sm:$0xff]  }
 0x134   :  { %4329 = vmatprep.subr.bf16.mxu1 %v5951_v60  ;;  %v6013_v60 = vld [vmem:[#allocation7 + $0xa60] ss:$16 sps:$4 sm:$0xff]  }
 0x136   :  { %4289 = vmatpush2.bf16.msra.mxu0 %v5946_v61  ;;  %v6018_v61 = vld [vmem:[#allocation7 + $0x844] ss:$16 sps:$4 sm:$0xff]  }
 0x137   :  { %4330 = vmatpush2.bf16.msra.mxu1 %v5949_v62  ;;  %4290 = vmatprep.subr.bf16.mxu0 %v5954_v63  ;;  %v6021_v62 = vld [vmem:[#allocation7 + $0xa44] ss:$16 sps:$4 sm:$0xff]   ;;  %v6016_v63 = vld [vmem:[#allocation7 + $0x840] ss:$16 sps:$4 sm:$0xff]  }
 0x138   :  { %4331 = vmatprep.subr.bf16.mxu1 %v5957_v0  ;;  %v6019_v0 = vld [vmem:[#allocation7 + $0xa40] ss:$16 sps:$4 sm:$0xff]  }
 0x13a   :  { %4291 = vmatpush2.bf16.msra.mxu0 %v5952_v1  ;;  %v6024_v1 = vld [vmem:[#allocation7 + $0x824] ss:$16 sps:$4 sm:$0xff]  }
 0x13b   :  { %4332 = vmatpush2.bf16.msra.mxu1 %v5955_v2  ;;  %4292 = vmatprep.subr.bf16.mxu0 %v5960_v3  ;;  %v6027_v2 = vld [vmem:[#allocation7 + $0xa24] ss:$16 sps:$4 sm:$0xff]   ;;  %v6022_v3 = vld [vmem:[#allocation7 + $0x820] ss:$16 sps:$4 sm:$0xff]  }
 0x13c   :  { %4333 = vmatprep.subr.bf16.mxu1 %v5963_v4  ;;  %v6025_v4 = vld [vmem:[#allocation7 + $0xa20] ss:$16 sps:$4 sm:$0xff]  }
 0x13e   :  { %4293 = vmatpush2.bf16.msra.mxu0 %v5958_v5  ;;  %v6030_v5 = vld [vmem:[#allocation7 + $0x804] ss:$16 sps:$4 sm:$0xff]  }
 0x13f   :  { %4334 = vmatpush2.bf16.msra.mxu1 %v5961_v6  ;;  %4294 = vmatprep.subr.bf16.mxu0 %v5966_v9  ;;  %v6033_v6 = vld [vmem:[#allocation7 + $0xa04] ss:$16 sps:$4 sm:$0xff]   ;;  %v6028_v9 = vld [vmem:[#allocation7 + $0x800] ss:$16 sps:$4 sm:$0xff]  }
 0x140   :  { %4335 = vmatprep.subr.bf16.mxu1 %v5969_v10  ;;  %v6031_v10 = vld [vmem:[#allocation7 + $0xa00] ss:$16 sps:$4 sm:$0xff]  }
 0x142   :  { %4295 = vmatpush2.bf16.msra.mxu0 %v5964_v11  ;;  %v6036_v11 = vld [vmem:[#allocation7 + $0x9e4] ss:$16 sps:$4 sm:$0xff]  }
 0x143   :  { %4336 = vmatpush2.bf16.msra.mxu1 %v5967_v12  ;;  %4296 = vmatprep.subr.bf16.mxu0 %v5972_v13  ;;  %v6039_v12 = vld [vmem:[#allocation7 + $0xbe4] ss:$16 sps:$4 sm:$0xff]   ;;  %v6034_v13 = vld [vmem:[#allocation7 + $0x9e0] ss:$16 sps:$4 sm:$0xff]  }
 0x144   :  { %4337 = vmatprep.subr.bf16.mxu1 %v5975_v14  ;;  %v6037_v14 = vld [vmem:[#allocation7 + $0xbe0] ss:$16 sps:$4 sm:$0xff]  }
 0x146   :  { %4297 = vmatpush2.bf16.msra.mxu0 %v5970_v23  ;;  %v6042_v23 = vld [vmem:[#allocation7 + $0x9c4] ss:$16 sps:$4 sm:$0xff]  }
 0x147   :  { %4338 = vmatpush2.bf16.msra.mxu1 %v5973_v24  ;;  %4298 = vmatprep.subr.bf16.mxu0 %v5978_v25  ;;  %v6045_v24 = vld [vmem:[#allocation7 + $0xbc4] ss:$16 sps:$4 sm:$0xff]   ;;  %v6040_v25 = vld [vmem:[#allocation7 + $0x9c0] ss:$16 sps:$4 sm:$0xff]  }
 0x148   :  { %4339 = vmatprep.subr.bf16.mxu1 %v5981_v7  ;;  %v6043_v7 = vld [vmem:[#allocation7 + $0xbc0] ss:$16 sps:$4 sm:$0xff]  }
 0x14a   :  { %4299 = vmatpush2.bf16.msra.mxu0 %v5976_v16  ;;  %v6048_v16 = vld [vmem:[#allocation7 + $0x9a4] ss:$16 sps:$4 sm:$0xff]  }
 0x14b   :  { %4340 = vmatpush2.bf16.msra.mxu1 %v5979_v26  ;;  %4350 = vmatprep.subr.bf16.mxu0 %v5988_v27  ;;  %v6051_v26 = vld [vmem:[#allocation7 + $0xba4] ss:$16 sps:$4 sm:$0xff]   ;;  %v6046_v27 = vld [vmem:[#allocation7 + $0x9a0] ss:$16 sps:$4 sm:$0xff]  }
 0x14c   :  { %4391 = vmatprep.subr.bf16.mxu1 %v5991_v28  ;;  %v6049_v28 = vld [vmem:[#allocation7 + $0xba0] ss:$16 sps:$4 sm:$0xff]  }
 0x14d   :  { %v1440_v22 = vpop.f32.mrf.mxu0  ;;  %4301 = vmatmul.mubr.bf16.vlgmr.msra.gmra.mxu0 %v6819_v31 }
 0x14e   :  { %v1481_v38 = vpop.f32.mrf.mxu1  ;;  %4342 = vmatmul.mubr.bf16.vlgmr.msra.gmra.mxu1 %v6823_v32  ;;  %4351 = vmatpush1.bf16.msra.mxu0 %v5986_v29  ;;  %v6054_v29 = vld [vmem:[#allocation7 + $0x984] ss:$16 sps:$4 sm:$0xff]  }
 0x14f   :  { %v6839_v39 = vadd.f32 %v1481_v38, %v1440_v22  ;;  %4392 = vmatpush1.bf16.msra.mxu1 %v5989_v30  ;;  %v1442_v42 = vpop.f32.mrf.mxu0  ;;  %4352 = vmatprep.subr.bf16.mxu0 %v5994_v35  ;;  %v6057_v30 = vld [vmem:[#allocation7 + $0xb84] ss:$16 sps:$4 sm:$0xff]   ;;  %v6052_v35 = vld [vmem:[#allocation7 + $0x980] ss:$16 sps:$4 sm:$0xff]  }
 0x150   :  { %v1483_v43 = vpop.f32.mrf.mxu1  ;;  %4393 = vmatprep.subr.bf16.mxu1 %v5997_v36  ;;  %4382 = vmatprep.mubr.bf16.mxu0 %v6831_v37  ;;  %v6055_v36 = vld [vmem:[#allocation7 + $0xb80] ss:$16 sps:$4 sm:$0xff]   ;;  %v6060_v22 = vld [vmem:[#allocation7 + $0x964] ss:$16 sps:$4 sm:$0xff]  }
 0x151   :  { %v6841_v46 = vadd.f32 %v1483_v43, %v1442_v42  ;;  %4423 = vmatprep.mubr.bf16.mxu1 %v6835_v19  ;;  %v1444_v47 = vpop.f32.mrf.mxu0  ;;  %v6063_v38 = vld [vmem:[#allocation7 + $0xb64] ss:$16 sps:$4 sm:$0xff]  }
 0x152   :  { %v1485_v48 = vpop.f32.mrf.mxu1  ;;  %4353 = vmatpush1.bf16.msra.mxu0 %v5992_v40  ;;  %v6058_v40 = vld [vmem:[#allocation7 + $0x960] ss:$16 sps:$4 sm:$0xff]   ;;  %v6066_v42 = vld [vmem:[#allocation7 + $0x944] ss:$16 sps:$4 sm:$0xff]  }
 0x153   :  { %4394 = vmatpush1.bf16.msra.mxu1 %v5995_v41  ;;  %v1445_v51 = vpop.f32.mrf.mxu0  ;;  %4354 = vmatprep.subr.bf16.mxu0 %v6000_v44  ;;  %v6061_v41 = vld [vmem:[#allocation7 + $0xb60] ss:$16 sps:$4 sm:$0xff]   ;;  %v6069_v43 = vld [vmem:[#allocation7 + $0xb44] ss:$16 sps:$4 sm:$0xff]  }
 0x154   :  { %v1486_v52 = vpop.f32.mrf.mxu1  ;;  %4395 = vmatprep.subr.bf16.mxu1 %v6003_v45  ;;  %v6064_v44 = vld [vmem:[#allocation7 + $0x940] ss:$16 sps:$4 sm:$0xff]   ;;  %v6072_v47 = vld [vmem:[#allocation7 + $0x924] ss:$16 sps:$4 sm:$0xff]  }
 0x155   :  { %v6067_v45 = vld [vmem:[#allocation7 + $0xb40] ss:$16 sps:$4 sm:$0xff]   ;;  %v6075_v48 = vld [vmem:[#allocation7 + $0xb24] ss:$16 sps:$4 sm:$0xff]  }
 0x156   :  { %4355 = vmatpush1.bf16.msra.mxu0 %v5998_v49  ;;  %v6070_v49 = vld [vmem:[#allocation7 + $0x920] ss:$16 sps:$4 sm:$0xff]   ;;  %v6078_v51 = vld [vmem:[#allocation7 + $0x904] ss:$16 sps:$4 sm:$0xff]  }
 0x157   :  { %4396 = vmatpush1.bf16.msra.mxu1 %v6001_v50  ;;  %4356 = vmatprep.subr.bf16.mxu0 %v6006_v53  ;;  %v6073_v50 = vld [vmem:[#allocation7 + $0xb20] ss:$16 sps:$4 sm:$0xff]   ;;  %v6081_v52 = vld [vmem:[#allocation7 + $0xb04] ss:$16 sps:$4 sm:$0xff]  }
 0x158   :  { %4397 = vmatprep.subr.bf16.mxu1 %v6009_v54  ;;  %v6076_v53 = vld [vmem:[#allocation7 + $0x900] ss:$16 sps:$4 sm:$0xff]  }
 0x159   :  { %v6079_v54 = vld [vmem:[#allocation7 + $0xb00] ss:$16 sps:$4 sm:$0xff]  }
 0x15a   :  { %4357 = vmatpush1.bf16.msra.mxu0 %v6004_v55  ;;  %v6088_v55 = vld [vmem:[#allocation7 + $0xce4] ss:$16 sps:$4 sm:$0xff]  }
 0x15b   :  { %4398 = vmatpush1.bf16.msra.mxu1 %v6007_v56  ;;  %4358 = vmatprep.subr.bf16.mxu0 %v6012_v57  ;;  %v6091_v56 = vld [vmem:[#allocation7 + $0xee4] ss:$16 sps:$4 sm:$0xff]  }
 0x15c   :  { %4399 = vmatprep.subr.bf16.mxu1 %v6015_v58  ;;  %v6845_v57 = vld [vmem:[#allocation3 + $0x30] sm:$0xff]  ;;  %v6847_v58 = vld [vmem:[#allocation3 + $0x38] sm:$0xff] }
 0x15e   :  { %4359 = vmatpush1.bf16.msra.mxu0 %v6010_v59  ;;  %v6086_v59 = vld [vmem:[#allocation7 + $0xce0] ss:$16 sps:$4 sm:$0xff]  }
 0x15f   :  { %4400 = vmatpush1.bf16.msra.mxu1 %v6013_v60  ;;  %4360 = vmatprep.subr.bf16.mxu0 %v6018_v61  ;;  %v6089_v60 = vld [vmem:[#allocation7 + $0xee0] ss:$16 sps:$4 sm:$0xff]   ;;  %v6851_v61 = vcombine.low %v6825_v33, %v6825_v33  ;;  %v6863_v33 = vcombine.high %v6847_v58, %v6847_v58 }
 0x160   :  { %4401 = vmatprep.subr.bf16.mxu1 %v6021_v62  ;;  %v6855_v62 = vcombine.low %v6827_v34, %v6827_v34 }
 0x162   :  { %4361 = vmatpush1.bf16.msra.mxu0 %v6016_v63  ;;  %v6094_v63 = vld [vmem:[#allocation7 + $0xcc4] ss:$16 sps:$4 sm:$0xff]  }
 0x163   :  { %4402 = vmatpush1.bf16.msra.mxu1 %v6019_v0  ;;  %4362 = vmatprep.subr.bf16.mxu0 %v6024_v1  ;;  %v6097_v0 = vld [vmem:[#allocation7 + $0xec4] ss:$16 sps:$4 sm:$0xff]   ;;  %v6092_v1 = vld [vmem:[#allocation7 + $0xcc0] ss:$16 sps:$4 sm:$0xff]  }
 0x164   :  { %4403 = vmatprep.subr.bf16.mxu1 %v6027_v2  ;;  %v6095_v2 = vld [vmem:[#allocation7 + $0xec0] ss:$16 sps:$4 sm:$0xff]  }
 0x166   :  { %4363 = vmatpush1.bf16.msra.mxu0 %v6022_v3  ;;  %v6859_v3 = vcombine.high %v6845_v57, %v6845_v57 }
 0x167   :  { %4404 = vmatpush1.bf16.msra.mxu1 %v6025_v4  ;;  %4364 = vmatprep.subr.bf16.mxu0 %v6030_v5 }
 0x168   :  { %4405 = vmatprep.subr.bf16.mxu1 %v6033_v6 }
 0x16a   :  { %4365 = vmatpush1.bf16.msra.mxu0 %v6028_v9 }
 0x16b   :  { %4406 = vmatpush1.bf16.msra.mxu1 %v6031_v10  ;;  %4366 = vmatprep.subr.bf16.mxu0 %v6036_v11  ;;  %v6100_v10 = vld [vmem:[#allocation7 + $0xca4] ss:$16 sps:$4 sm:$0xff]  }
 0x16c   :  { %4407 = vmatprep.subr.bf16.mxu1 %v6039_v12  ;;  %v6103_v11 = vld [vmem:[#allocation7 + $0xea4] ss:$16 sps:$4 sm:$0xff]  }
 0x16e   :  { %4367 = vmatpush2.bf16.msra.mxu0 %v6034_v13  ;;  %v6098_v13 = vld [vmem:[#allocation7 + $0xca0] ss:$16 sps:$4 sm:$0xff]  }
 0x16f   :  { %4408 = vmatpush2.bf16.msra.mxu1 %v6037_v14  ;;  %4368 = vmatprep.subr.bf16.mxu0 %v6042_v23  ;;  %v6101_v14 = vld [vmem:[#allocation7 + $0xea0] ss:$16 sps:$4 sm:$0xff]  }
 0x170   :  { %4409 = vmatprep.subr.bf16.mxu1 %v6045_v24 }
 0x172   :  { %4369 = vmatpush2.bf16.msra.mxu0 %v6040_v25 }
 0x173   :  { %4410 = vmatpush2.bf16.msra.mxu1 %v6043_v7  ;;  %4370 = vmatprep.subr.bf16.mxu0 %v6048_v16  ;;  %v6106_v16 = vld [vmem:[#allocation7 + $0xc84] ss:$16 sps:$4 sm:$0xff]  }
 0x174   :  { %4411 = vmatprep.subr.bf16.mxu1 %v6051_v26  ;;  %v6109_v26 = vld [vmem:[#allocation7 + $0xe84] ss:$16 sps:$4 sm:$0xff]  }
 0x176   :  { %4371 = vmatpush2.bf16.msra.mxu0 %v6046_v27  ;;  %v6104_v27 = vld [vmem:[#allocation7 + $0xc80] ss:$16 sps:$4 sm:$0xff]  }
 0x177   :  { %4412 = vmatpush2.bf16.msra.mxu1 %v6049_v28  ;;  %4372 = vmatprep.subr.bf16.mxu0 %v6054_v29  ;;  %v6107_v28 = vld [vmem:[#allocation7 + $0xe80] ss:$16 sps:$4 sm:$0xff]   ;;  %v6112_v29 = vld [vmem:[#allocation7 + $0xc64] ss:$16 sps:$4 sm:$0xff]  }
 0x178   :  { %4413 = vmatprep.subr.bf16.mxu1 %v6057_v30  ;;  %v6115_v30 = vld [vmem:[#allocation7 + $0xe64] ss:$16 sps:$4 sm:$0xff]  }
 0x17a   :  { %4373 = vmatpush2.bf16.msra.mxu0 %v6052_v35  ;;  %v6110_v35 = vld [vmem:[#allocation7 + $0xc60] ss:$16 sps:$4 sm:$0xff]  }
 0x17b   :  { %4414 = vmatpush2.bf16.msra.mxu1 %v6055_v36  ;;  %4374 = vmatprep.subr.bf16.mxu0 %v6060_v22  ;;  %v6113_v36 = vld [vmem:[#allocation7 + $0xe60] ss:$16 sps:$4 sm:$0xff]   ;;  %v6118_v22 = vld [vmem:[#allocation7 + $0xc44] ss:$16 sps:$4 sm:$0xff]  }
 0x17c   :  { %4415 = vmatprep.subr.bf16.mxu1 %v6063_v38  ;;  %v6121_v38 = vld [vmem:[#allocation7 + $0xe44] ss:$16 sps:$4 sm:$0xff]  }
 0x17e   :  { %4375 = vmatpush2.bf16.msra.mxu0 %v6058_v40  ;;  %v6116_v40 = vld [vmem:[#allocation7 + $0xc40] ss:$16 sps:$4 sm:$0xff]  }
 0x17f   :  { %4416 = vmatpush2.bf16.msra.mxu1 %v6061_v41  ;;  %4376 = vmatprep.subr.bf16.mxu0 %v6066_v42  ;;  %v6119_v41 = vld [vmem:[#allocation7 + $0xe40] ss:$16 sps:$4 sm:$0xff]   ;;  %v6124_v42 = vld [vmem:[#allocation7 + $0xc24] ss:$16 sps:$4 sm:$0xff]  }
 0x180   :  { %4417 = vmatprep.subr.bf16.mxu1 %v6069_v43  ;;  %v6127_v43 = vld [vmem:[#allocation7 + $0xe24] ss:$16 sps:$4 sm:$0xff]  }
 0x182   :  { %4377 = vmatpush2.bf16.msra.mxu0 %v6064_v44  ;;  %v6122_v44 = vld [vmem:[#allocation7 + $0xc20] ss:$16 sps:$4 sm:$0xff]  }
 0x183   :  { %4418 = vmatpush2.bf16.msra.mxu1 %v6067_v45  ;;  %4378 = vmatprep.subr.bf16.mxu0 %v6072_v47  ;;  %v6125_v45 = vld [vmem:[#allocation7 + $0xe20] ss:$16 sps:$4 sm:$0xff]   ;;  %v6130_v47 = vld [vmem:[#allocation7 + $0xc04] ss:$16 sps:$4 sm:$0xff]  }
 0x184   :  { %4419 = vmatprep.subr.bf16.mxu1 %v6075_v48  ;;  %v6133_v48 = vld [vmem:[#allocation7 + $0xe04] ss:$16 sps:$4 sm:$0xff]  }
 0x186   :  { %4379 = vmatpush2.bf16.msra.mxu0 %v6070_v49  ;;  %v6128_v49 = vld [vmem:[#allocation7 + $0xc00] ss:$16 sps:$4 sm:$0xff]  }
 0x187   :  { %4420 = vmatpush2.bf16.msra.mxu1 %v6073_v50  ;;  %4380 = vmatprep.subr.bf16.mxu0 %v6078_v51  ;;  %v6131_v50 = vld [vmem:[#allocation7 + $0xe00] ss:$16 sps:$4 sm:$0xff]   ;;  %v6136_v51 = vld [vmem:[#allocation7 + $0xde4] ss:$16 sps:$4 sm:$0xff]  }
 0x188   :  { %4421 = vmatprep.subr.bf16.mxu1 %v6081_v52  ;;  %v6139_v52 = vld [vmem:[#allocation7 + $0xfe4] ss:$16 sps:$4 sm:$0xff]  }
 0x18a   :  { %4381 = vmatpush2.bf16.msra.mxu0 %v6076_v53  ;;  %v6134_v53 = vld [vmem:[#allocation7 + $0xde0] ss:$16 sps:$4 sm:$0xff]  }
 0x18b   :  { %4422 = vmatpush2.bf16.msra.mxu1 %v6079_v54  ;;  %4432 = vmatprep.subr.bf16.mxu0 %v6088_v55  ;;  %v6137_v54 = vld [vmem:[#allocation7 + $0xfe0] ss:$16 sps:$4 sm:$0xff]   ;;  %v6142_v55 = vld [vmem:[#allocation7 + $0xdc4] ss:$16 sps:$4 sm:$0xff]  }
 0x18c   :  { %4473 = vmatprep.subr.bf16.mxu1 %v6091_v56  ;;  %v6145_v56 = vld [vmem:[#allocation7 + $0xfc4] ss:$16 sps:$4 sm:$0xff]  }
 0x18d   :  { %v1522_v4 = vpop.f32.mrf.mxu0  ;;  %4383 = vmatmul.mubr.bf16.vlgmr.msra.gmra.mxu0 %v6851_v61 }
 0x18e   :  { %v1563_v5 = vpop.f32.mrf.mxu1  ;;  %4424 = vmatmul.mubr.bf16.vlgmr.msra.gmra.mxu1 %v6855_v62  ;;  %4433 = vmatpush1.bf16.msra.mxu0 %v6086_v59  ;;  %v6140_v59 = vld [vmem:[#allocation7 + $0xdc0] ss:$16 sps:$4 sm:$0xff]  }
 0x18f   :  { %v6867_v34 = vadd.f32 %v1563_v5, %v1522_v4  ;;  %4474 = vmatpush1.bf16.msra.mxu1 %v6089_v60  ;;  %v1524_v6 = vpop.f32.mrf.mxu0  ;;  %4434 = vmatprep.subr.bf16.mxu0 %v6094_v63  ;;  %v6143_v60 = vld [vmem:[#allocation7 + $0xfc0] ss:$16 sps:$4 sm:$0xff]   ;;  %v6148_v63 = vld [vmem:[#allocation7 + $0xda4] ss:$16 sps:$4 sm:$0xff]  }
 0x190   :  { %v1565_v9 = vpop.f32.mrf.mxu1  ;;  %4475 = vmatprep.subr.bf16.mxu1 %v6097_v0  ;;  %4464 = vmatprep.mubr.bf16.mxu0 %v6859_v3  ;;  %v6151_v0 = vld [vmem:[#allocation7 + $0xfa4] ss:$16 sps:$4 sm:$0xff]  }
 0x191   :  { %v6869_v12 = vadd.f32 %v1565_v9, %v1524_v6  ;;  %4505 = vmatprep.mubr.bf16.mxu1 %v6863_v33  ;;  %v1526_v23 = vpop.f32.mrf.mxu0  ;;  %v6154_v4 = vld [vmem:[#allocation7 + $0xd84] ss:$16 sps:$4 sm:$0xff]   ;;  %v6152_v6 = vld [vmem:[#allocation7 + $0xd80] ss:$16 sps:$4 sm:$0xff]  }
 0x192   :  { %v1567_v24 = vpop.f32.mrf.mxu1  ;;  %4435 = vmatpush1.bf16.msra.mxu0 %v6092_v1  ;;  %v6146_v1 = vld [vmem:[#allocation7 + $0xda0] ss:$16 sps:$4 sm:$0xff]   ;;  %v6157_v5 = vld [vmem:[#allocation7 + $0xf84] ss:$16 sps:$4 sm:$0xff]  }
 0x193   :  { %4476 = vmatpush1.bf16.msra.mxu1 %v6095_v2  ;;  %v1527_v25 = vpop.f32.mrf.mxu0  ;;  %4436 = vmatprep.subr.bf16.mxu0 %v6100_v10  ;;  %v6149_v2 = vld [vmem:[#allocation7 + $0xfa0] ss:$16 sps:$4 sm:$0xff]   ;;  %v6160_v10 = vld [vmem:[#allocation7 + $0xd64] ss:$16 sps:$4 sm:$0xff]  }
 0x194   :  { %v1568_v7 = vpop.f32.mrf.mxu1  ;;  %4477 = vmatprep.subr.bf16.mxu1 %v6103_v11  ;;  %v6155_v9 = vld [vmem:[#allocation7 + $0xf80] ss:$16 sps:$4 sm:$0xff]   ;;  %v6163_v11 = vld [vmem:[#allocation7 + $0xf64] ss:$16 sps:$4 sm:$0xff]  }
 0x195   :  { %v6166_v23 = vld [vmem:[#allocation7 + $0xd44] ss:$16 sps:$4 sm:$0xff]   ;;  %v6164_v25 = vld [vmem:[#allocation7 + $0xd40] ss:$16 sps:$4 sm:$0xff]  }
 0x196   :  { %4437 = vmatpush1.bf16.msra.mxu0 %v6098_v13  ;;  %v6158_v13 = vld [vmem:[#allocation7 + $0xd60] ss:$16 sps:$4 sm:$0xff]   ;;  %v6169_v24 = vld [vmem:[#allocation7 + $0xf44] ss:$16 sps:$4 sm:$0xff]  }
 0x197   :  { %4478 = vmatpush1.bf16.msra.mxu1 %v6101_v14  ;;  %4438 = vmatprep.subr.bf16.mxu0 %v6106_v16  ;;  %v6161_v14 = vld [vmem:[#allocation7 + $0xf60] ss:$16 sps:$4 sm:$0xff]   ;;  %v6172_v16 = vld [vmem:[#allocation7 + $0xd24] ss:$16 sps:$4 sm:$0xff]  }
 0x198   :  { %4479 = vmatprep.subr.bf16.mxu1 %v6109_v26  ;;  %v6167_v7 = vld [vmem:[#allocation7 + $0xf40] ss:$16 sps:$4 sm:$0xff]   ;;  %v6175_v26 = vld [vmem:[#allocation7 + $0xf24] ss:$16 sps:$4 sm:$0xff]  }
 0x19a   :  { %4439 = vmatpush1.bf16.msra.mxu0 %v6104_v27  ;;  %v6170_v27 = vld [vmem:[#allocation7 + $0xd20] ss:$16 sps:$4 sm:$0xff]  }
 0x19b   :  { %4480 = vmatpush1.bf16.msra.mxu1 %v6107_v28  ;;  %4440 = vmatprep.subr.bf16.mxu0 %v6112_v29  ;;  %v6173_v28 = vld [vmem:[#allocation7 + $0xf20] ss:$16 sps:$4 sm:$0xff]   ;;  %v6178_v29 = vld [vmem:[#allocation7 + $0xd04] ss:$16 sps:$4 sm:$0xff]  }
 0x19c   :  { %4481 = vmatprep.subr.bf16.mxu1 %v6115_v30  ;;  %v6181_v30 = vld [vmem:[#allocation7 + $0xf04] ss:$16 sps:$4 sm:$0xff]  }
 0x19e   :  { %4441 = vmatpush1.bf16.msra.mxu0 %v6110_v35  ;;  %v6176_v35 = vld [vmem:[#allocation7 + $0xd00] ss:$16 sps:$4 sm:$0xff]  }
 0x19f   :  { %4482 = vmatpush1.bf16.msra.mxu1 %v6113_v36  ;;  %4442 = vmatprep.subr.bf16.mxu0 %v6118_v22  ;;  %v6179_v36 = vld [vmem:[#allocation7 + $0xf00] ss:$16 sps:$4 sm:$0xff]   ;;  %v6188_v22 = vld [vmem:[#allocation7 + $0xec] ss:$16 sps:$4 sm:$0xff]  }
 0x1a0   :  { %4483 = vmatprep.subr.bf16.mxu1 %v6121_v38  ;;  %v6191_v38 = vld [vmem:[#allocation7 + $0x2ec] ss:$16 sps:$4 sm:$0xff]  }
 0x1a2   :  { %4443 = vmatpush1.bf16.msra.mxu0 %v6116_v40  ;;  %v6186_v40 = vld [vmem:[#allocation7 + $0xe8] ss:$16 sps:$4 sm:$0xff]  }
 0x1a3   :  { %4484 = vmatpush1.bf16.msra.mxu1 %v6119_v41  ;;  %4444 = vmatprep.subr.bf16.mxu0 %v6124_v42  ;;  %v6189_v41 = vld [vmem:[#allocation7 + $0x2e8] ss:$16 sps:$4 sm:$0xff]   ;;  %v6875_v42 = vcombine.low %v6845_v57, %v6845_v57 }
 0x1a4   :  { %4485 = vmatprep.subr.bf16.mxu1 %v6127_v43  ;;  %v6879_v43 = vcombine.low %v6847_v58, %v6847_v58 }
 0x1a6   :  { %4445 = vmatpush1.bf16.msra.mxu0 %v6122_v44  ;;  %v6194_v44 = vld [vmem:[#allocation7 + $0xcc] ss:$16 sps:$4 sm:$0xff]  }
 0x1a7   :  { %4486 = vmatpush1.bf16.msra.mxu1 %v6125_v45  ;;  %4446 = vmatprep.subr.bf16.mxu0 %v6130_v47  ;;  %v6197_v45 = vld [vmem:[#allocation7 + $0x2cc] ss:$16 sps:$4 sm:$0xff]   ;;  %v6192_v47 = vld [vmem:[#allocation7 + $0xc8] ss:$16 sps:$4 sm:$0xff]  }
 0x1a8   :  { %4487 = vmatprep.subr.bf16.mxu1 %v6133_v48 }
 0x1aa   :  { %4447 = vmatpush1.bf16.msra.mxu0 %v6128_v49 }
 0x1ab   :  { %4488 = vmatpush1.bf16.msra.mxu1 %v6131_v50  ;;  %4448 = vmatprep.subr.bf16.mxu0 %v6136_v51  ;;  %v6195_v50 = vld [vmem:[#allocation7 + $0x2c8] ss:$16 sps:$4 sm:$0xff]  }
 0x1ac   :  { %4489 = vmatprep.subr.bf16.mxu1 %v6139_v52  ;;  %v6200_v52 = vld [vmem:[#allocation7 + $0xac] ss:$16 sps:$4 sm:$0xff]  }
 0x1ae   :  { %4449 = vmatpush2.bf16.msra.mxu0 %v6134_v53  ;;  %v6203_v53 = vld [vmem:[#allocation7 + $0x2ac] ss:$16 sps:$4 sm:$0xff]  }
 0x1af   :  { %4490 = vmatpush2.bf16.msra.mxu1 %v6137_v54  ;;  %4450 = vmatprep.subr.bf16.mxu0 %v6142_v55 }
 0x1b0   :  { %4491 = vmatprep.subr.bf16.mxu1 %v6145_v56 }
 0x1b2   :  { %4451 = vmatpush2.bf16.msra.mxu0 %v6140_v59 }
 0x1b3   :  { %4492 = vmatpush2.bf16.msra.mxu1 %v6143_v60  ;;  %4452 = vmatprep.subr.bf16.mxu0 %v6148_v63  ;;  %v6198_v60 = vld [vmem:[#allocation7 + $0xa8] ss:$16 sps:$4 sm:$0xff]  }
 0x1b4   :  { %4493 = vmatprep.subr.bf16.mxu1 %v6151_v0  ;;  %v6201_v63 = vld [vmem:[#allocation7 + $0x2a8] ss:$16 sps:$4 sm:$0xff]  }
 0x1b6   :  { %4453 = vmatpush2.bf16.msra.mxu0 %v6146_v1 }
 0x1b7   :  { %4494 = vmatpush2.bf16.msra.mxu1 %v6149_v2  ;;  %4454 = vmatprep.subr.bf16.mxu0 %v6154_v4  ;;  %v6206_v2 = vld [vmem:[#allocation7 + $0x8c] ss:$16 sps:$4 sm:$0xff]  }
 0x1b8   :  { %4495 = vmatprep.subr.bf16.mxu1 %v6157_v5  ;;  %v6209_v4 = vld [vmem:[#allocation7 + $0x28c] ss:$16 sps:$4 sm:$0xff]  }
 0x1b9   :  { %v6215_v5 = vld [vmem:[#allocation7 + $0x26c] ss:$16 sps:$4 sm:$0xff]  }
 0x1ba   :  { %4455 = vmatpush2.bf16.msra.mxu0 %v6152_v6  ;;  %v6210_v6 = vld [vmem:[#allocation7 + $0x68] ss:$16 sps:$4 sm:$0xff]  }
 0x1bb   :  { %4496 = vmatpush2.bf16.msra.mxu1 %v6155_v9  ;;  %4456 = vmatprep.subr.bf16.mxu0 %v6160_v10  ;;  %v6213_v9 = vld [vmem:[#allocation7 + $0x268] ss:$16 sps:$4 sm:$0xff]   ;;  %v6218_v10 = vld [vmem:[#allocation7 + $0x4c] ss:$16 sps:$4 sm:$0xff]  }
 0x1bc   :  { %4497 = vmatprep.subr.bf16.mxu1 %v6163_v11  ;;  %v6221_v11 = vld [vmem:[#allocation7 + $0x24c] ss:$16 sps:$4 sm:$0xff]  }
 0x1be   :  { %4457 = vmatpush2.bf16.msra.mxu0 %v6158_v13  ;;  %v6216_v13 = vld [vmem:[#allocation7 + $0x48] ss:$16 sps:$4 sm:$0xff]  }
 0x1bf   :  { %4498 = vmatpush2.bf16.msra.mxu1 %v6161_v14  ;;  %4458 = vmatprep.subr.bf16.mxu0 %v6166_v23  ;;  %v6219_v14 = vld [vmem:[#allocation7 + $0x248] ss:$16 sps:$4 sm:$0xff]   ;;  %v6224_v23 = vld [vmem:[#allocation7 + $0x2c] ss:$16 sps:$4 sm:$0xff]  }
 0x1c0   :  { %4499 = vmatprep.subr.bf16.mxu1 %v6169_v24  ;;  %v6227_v24 = vld [vmem:[#allocation7 + $0x22c] ss:$16 sps:$4 sm:$0xff]  }
 0x1c2   :  { %4459 = vmatpush2.bf16.msra.mxu0 %v6164_v25  ;;  %v6222_v25 = vld [vmem:[#allocation7 + $0x28] ss:$16 sps:$4 sm:$0xff]  }
 0x1c3   :  { %4500 = vmatpush2.bf16.msra.mxu1 %v6167_v7  ;;  %4460 = vmatprep.subr.bf16.mxu0 %v6172_v16  ;;  %v6225_v7 = vld [vmem:[#allocation7 + $0x228] ss:$16 sps:$4 sm:$0xff]   ;;  %v6230_v16 = vld [vmem:[#allocation7 + $0xc] ss:$16 sps:$4 sm:$0xff]  }
 0x1c4   :  { %4501 = vmatprep.subr.bf16.mxu1 %v6175_v26  ;;  %v6233_v26 = vld [vmem:[#allocation7 + $0x20c] ss:$16 sps:$4 sm:$0xff]  }
 0x1c6   :  { %4461 = vmatpush2.bf16.msra.mxu0 %v6170_v27  ;;  %v6228_v27 = vld [vmem:[#allocation7 + $0x8] ss:$16 sps:$4 sm:$0xff]  }
 0x1c7   :  { %4502 = vmatpush2.bf16.msra.mxu1 %v6173_v28  ;;  %4462 = vmatprep.subr.bf16.mxu0 %v6178_v29  ;;  %v6231_v28 = vld [vmem:[#allocation7 + $0x208] ss:$16 sps:$4 sm:$0xff]   ;;  %v6236_v29 = vld [vmem:[#allocation7 + $0x1ec] ss:$16 sps:$4 sm:$0xff]  }
 0x1c8   :  { %4503 = vmatprep.subr.bf16.mxu1 %v6181_v30  ;;  %v6239_v30 = vld [vmem:[#allocation7 + $0x3ec] ss:$16 sps:$4 sm:$0xff]  }
 0x1ca   :  { %4463 = vmatpush2.bf16.msra.mxu0 %v6176_v35  ;;  %v6234_v35 = vld [vmem:[#allocation7 + $0x1e8] ss:$16 sps:$4 sm:$0xff]  }
 0x1cb   :  { %4504 = vmatpush2.bf16.msra.mxu1 %v6179_v36  ;;  %4514 = vmatprep.subr.bf16.mxu0 %v6188_v22  ;;  %v6237_v36 = vld [vmem:[#allocation7 + $0x3e8] ss:$16 sps:$4 sm:$0xff]   ;;  %v6242_v22 = vld [vmem:[#allocation7 + $0x1cc] ss:$16 sps:$4 sm:$0xff]  }
 0x1cc   :  { %4555 = vmatprep.subr.bf16.mxu1 %v6191_v38  ;;  %v6245_v38 = vld [vmem:[#allocation7 + $0x3cc] ss:$16 sps:$4 sm:$0xff]  }
 0x1cd   :  { %v4220_v48 = vpop.f32.mrf.mxu0  ;;  %4465 = vmatmul.mubr.bf16.vlgmr.msra.gmra.mxu0 %v6875_v42 }
 0x1ce   :  { %v4261_v49 = vpop.f32.mrf.mxu1  ;;  %4506 = vmatmul.mubr.bf16.vlgmr.msra.gmra.mxu1 %v6879_v43  ;;  %v4221_v57 = vadd.f32 %v4220_v48, %v6839_v39  ;;  %4515 = vmatpush1.bf16.msra.mxu0 %v6186_v40  ;;  %v6240_v40 = vld [vmem:[#allocation7 + $0x1c8] ss:$16 sps:$4 sm:$0xff]  }
 0x1cf   :  { %4556 = vmatpush1.bf16.msra.mxu1 %v6189_v41  ;;  %v4222_v58 = vpop.f32.mrf.mxu0  ;;  %4516 = vmatprep.subr.bf16.mxu0 %v6194_v44  ;;  %v6243_v41 = vld [vmem:[#allocation7 + $0x3c8] ss:$16 sps:$4 sm:$0xff]   ;;  %v6248_v44 = vld [vmem:[#allocation7 + $0x1ac] ss:$16 sps:$4 sm:$0xff]  }
 0x1d0   :  { %v4263_v51 = vpop.f32.mrf.mxu1  ;;  %4557 = vmatprep.subr.bf16.mxu1 %v6197_v45  ;;  %v6884_v54 = vadd.f32 %v4261_v49, %v4221_v57  ;;  %v4223_v55 = vadd.f32 %v4222_v58, %v6841_v46  ;;  %4546 = vmatprep.mubr.bf16.mxu0 %v6783_v17  ;;  %v6204_v46 = vld [vmem:[#allocation7 + $0x88] ss:$16 sps:$4 sm:$0xff]   ;;  %v6251_v45 = vld [vmem:[#allocation7 + $0x3ac] ss:$16 sps:$4 sm:$0xff]  }
 0x1d1   :  { %4587 = vmatprep.mubr.bf16.mxu1 %v6787_v18  ;;  %v4224_v56 = vpop.f32.mrf.mxu0  ;;  %v6207_v17 = vld [vmem:[#allocation7 + $0x288] ss:$16 sps:$4 sm:$0xff]   ;;  %v6212_v18 = vld [vmem:[#allocation7 + $0x6c] ss:$16 sps:$4 sm:$0xff]  }
 0x1d2   :  { %v4265_v59 = vpop.f32.mrf.mxu1  ;;  %v6889_v39 = vadd.f32 %v4263_v51, %v4223_v55  ;;  %4517 = vmatpush1.bf16.msra.mxu0 %v6192_v47  ;;  %v6246_v47 = vld [vmem:[#allocation7 + $0x1a8] ss:$16 sps:$4 sm:$0xff]   ;;  %v6254_v49 = vld [vmem:[#allocation7 + $0x18c] ss:$16 sps:$4 sm:$0xff]  }
 0x1d3   :  { %4558 = vmatpush1.bf16.msra.mxu1 %v6195_v50  ;;  %v4225_v0 = vpop.f32.mrf.mxu0  ;;  %4518 = vmatprep.subr.bf16.mxu0 %v6200_v52  ;;  %v6249_v48 = vld [vmem:[#allocation7 + $0x3a8] ss:$16 sps:$4 sm:$0xff]   ;;  %v6257_v57 = vld [vmem:[#allocation7 + $0x38c] ss:$16 sps:$4 sm:$0xff]  }
 0x1d4   :  { %v4266_v1 = vpop.f32.mrf.mxu1  ;;  %4559 = vmatprep.subr.bf16.mxu1 %v6203_v53  ;;  %v6252_v50 = vld [vmem:[#allocation7 + $0x188] ss:$16 sps:$4 sm:$0xff]   ;;  %v6260_v51 = vld [vmem:[#allocation7 + $0x16c] ss:$16 sps:$4 sm:$0xff]  }
 0x1d5   :  { %v6255_v58 = vld [vmem:[#allocation7 + $0x388] ss:$16 sps:$4 sm:$0xff]   ;;  %v6263_v52 = vld [vmem:[#allocation7 + $0x36c] ss:$16 sps:$4 sm:$0xff]  }
 0x1d6   :  { %4519 = vmatpush1.bf16.msra.mxu0 %v6198_v60  ;;  %v6258_v53 = vld [vmem:[#allocation7 + $0x168] ss:$16 sps:$4 sm:$0xff]   ;;  %v6266_v56 = vld [vmem:[#allocation7 + $0x14c] ss:$16 sps:$4 sm:$0xff]  }
 0x1d7   :  { %4560 = vmatpush1.bf16.msra.mxu1 %v6201_v63  ;;  %4520 = vmatprep.subr.bf16.mxu0 %v6206_v2  ;;  %v6261_v55 = vld [vmem:[#allocation7 + $0x368] ss:$16 sps:$4 sm:$0xff]   ;;  %v6269_v59 = vld [vmem:[#allocation7 + $0x34c] ss:$16 sps:$4 sm:$0xff]  }
 0x1d8   :  { %4561 = vmatprep.subr.bf16.mxu1 %v6209_v4  ;;  %v6264_v60 = vld [vmem:[#allocation7 + $0x148] ss:$16 sps:$4 sm:$0xff]   ;;  %v6272_v0 = vld [vmem:[#allocation7 + $0x12c] ss:$16 sps:$4 sm:$0xff]  }
 0x1d9   :  { %v6267_v63 = vld [vmem:[#allocation7 + $0x348] ss:$16 sps:$4 sm:$0xff]   ;;  %v6275_v1 = vld [vmem:[#allocation7 + $0x32c] ss:$16 sps:$4 sm:$0xff]  }
 0x1da   :  { %4521 = vmatpush1.bf16.msra.mxu0 %v6204_v46  ;;  %v6270_v2 = vld [vmem:[#allocation7 + $0x128] ss:$16 sps:$4 sm:$0xff]   ;;  %v6278_v46 = vld [vmem:[#allocation7 + $0x10c] ss:$16 sps:$4 sm:$0xff]  }
 0x1db   :  { %4562 = vmatpush1.bf16.msra.mxu1 %v6207_v17  ;;  %4522 = vmatprep.subr.bf16.mxu0 %v6212_v18  ;;  %v6273_v4 = vld [vmem:[#allocation7 + $0x328] ss:$16 sps:$4 sm:$0xff]   ;;  %v6281_v17 = vld [vmem:[#allocation7 + $0x30c] ss:$16 sps:$4 sm:$0xff]  }
 0x1dc   :  { %4563 = vmatprep.subr.bf16.mxu1 %v6215_v5  ;;  %v6276_v18 = vld [vmem:[#allocation7 + $0x108] ss:$16 sps:$4 sm:$0xff]  }
 0x1dd   :  { %v6279_v5 = vld [vmem:[#allocation7 + $0x308] ss:$16 sps:$4 sm:$0xff]  }
 0x1de   :  { %4523 = vmatpush1.bf16.msra.mxu0 %v6210_v6  ;;  %v6284_v6 = vld [vmem:[#allocation7 + $0x4ec] ss:$16 sps:$4 sm:$0xff]  }
 0x1df   :  { %4564 = vmatpush1.bf16.msra.mxu1 %v6213_v9  ;;  %4524 = vmatprep.subr.bf16.mxu0 %v6218_v10  ;;  %v6287_v9 = vld [vmem:[#allocation7 + $0x6ec] ss:$16 sps:$4 sm:$0xff]   ;;  %v6282_v10 = vld [vmem:[#allocation7 + $0x4e8] ss:$16 sps:$4 sm:$0xff]  }
 0x1e0   :  { %4565 = vmatprep.subr.bf16.mxu1 %v6221_v11  ;;  %v6285_v11 = vld [vmem:[#allocation7 + $0x6e8] ss:$16 sps:$4 sm:$0xff]  }
 0x1e2   :  { %4525 = vmatpush1.bf16.msra.mxu0 %v6216_v13  ;;  %v6290_v13 = vld [vmem:[#allocation7 + $0x4cc] ss:$16 sps:$4 sm:$0xff]  }
 0x1e3   :  { %4566 = vmatpush1.bf16.msra.mxu1 %v6219_v14  ;;  %4526 = vmatprep.subr.bf16.mxu0 %v6224_v23  ;;  %v6293_v14 = vld [vmem:[#allocation7 + $0x6cc] ss:$16 sps:$4 sm:$0xff]  }
 0x1e4   :  { %4567 = vmatprep.subr.bf16.mxu1 %v6227_v24 }
 0x1e6   :  { %4527 = vmatpush1.bf16.msra.mxu0 %v6222_v25 }
 0x1e7   :  { %4568 = vmatpush1.bf16.msra.mxu1 %v6225_v7  ;;  %4528 = vmatprep.subr.bf16.mxu0 %v6230_v16  ;;  %v6288_v7 = vld [vmem:[#allocation7 + $0x4c8] ss:$16 sps:$4 sm:$0xff]  }
 0x1e8   :  { %4569 = vmatprep.subr.bf16.mxu1 %v6233_v26  ;;  %v6291_v16 = vld [vmem:[#allocation7 + $0x6c8] ss:$16 sps:$4 sm:$0xff]  }
 0x1ea   :  { %4529 = vmatpush1.bf16.msra.mxu0 %v6228_v27 }
 0x1eb   :  { %4570 = vmatpush1.bf16.msra.mxu1 %v6231_v28  ;;  %4530 = vmatprep.subr.bf16.mxu0 %v6236_v29  ;;  %v6296_v28 = vld [vmem:[#allocation7 + $0x4ac] ss:$16 sps:$4 sm:$0xff]  }
 0x1ec   :  { %4571 = vmatprep.subr.bf16.mxu1 %v6239_v30  ;;  %v6299_v29 = vld [vmem:[#allocation7 + $0x6ac] ss:$16 sps:$4 sm:$0xff]  }
 0x1ee   :  { %4531 = vmatpush2.bf16.msra.mxu0 %v6234_v35 }
 0x1ef   :  { %4572 = vmatpush2.bf16.msra.mxu1 %v6237_v36  ;;  %4532 = vmatprep.subr.bf16.mxu0 %v6242_v22  ;;  %v6294_v36 = vld [vmem:[#allocation7 + $0x4a8] ss:$16 sps:$4 sm:$0xff]  }
 0x1f0   :  { %4573 = vmatprep.subr.bf16.mxu1 %v6245_v38  ;;  %v6297_v22 = vld [vmem:[#allocation7 + $0x6a8] ss:$16 sps:$4 sm:$0xff]  }
 0x1f2   :  { %4533 = vmatpush2.bf16.msra.mxu0 %v6240_v40 }
 0x1f3   :  { %4574 = vmatpush2.bf16.msra.mxu1 %v6243_v41  ;;  %4534 = vmatprep.subr.bf16.mxu0 %v6248_v44  ;;  %v6302_v41 = vld [vmem:[#allocation7 + $0x48c] ss:$16 sps:$4 sm:$0xff]  }
 0x1f4   :  { %4575 = vmatprep.subr.bf16.mxu1 %v6251_v45  ;;  %v6305_v44 = vld [vmem:[#allocation7 + $0x68c] ss:$16 sps:$4 sm:$0xff]  }
 0x1f5   :  { %v6311_v45 = vld [vmem:[#allocation7 + $0x66c] ss:$16 sps:$4 sm:$0xff]  }
 0x1f6   :  { %4535 = vmatpush2.bf16.msra.mxu0 %v6246_v47  ;;  %v6306_v47 = vld [vmem:[#allocation7 + $0x468] ss:$16 sps:$4 sm:$0xff]  }
 0x1f7   :  { %4576 = vmatpush2.bf16.msra.mxu1 %v6249_v48  ;;  %4536 = vmatprep.subr.bf16.mxu0 %v6254_v49  ;;  %v6309_v48 = vld [vmem:[#allocation7 + $0x668] ss:$16 sps:$4 sm:$0xff]   ;;  %v6314_v49 = vld [vmem:[#allocation7 + $0x44c] ss:$16 sps:$4 sm:$0xff]  }
 0x1f8   :  { %4577 = vmatprep.subr.bf16.mxu1 %v6257_v57  ;;  %v6317_v57 = vld [vmem:[#allocation7 + $0x64c] ss:$16 sps:$4 sm:$0xff]  }
 0x1fa   :  { %4537 = vmatpush2.bf16.msra.mxu0 %v6252_v50  ;;  %v6312_v50 = vld [vmem:[#allocation7 + $0x448] ss:$16 sps:$4 sm:$0xff]  }
 0x1fb   :  { %4578 = vmatpush2.bf16.msra.mxu1 %v6255_v58  ;;  %4538 = vmatprep.subr.bf16.mxu0 %v6260_v51  ;;  %v6315_v58 = vld [vmem:[#allocation7 + $0x648] ss:$16 sps:$4 sm:$0xff]   ;;  %v6320_v51 = vld [vmem:[#allocation7 + $0x42c] ss:$16 sps:$4 sm:$0xff]  }
 0x1fc   :  { %4579 = vmatprep.subr.bf16.mxu1 %v6263_v52  ;;  %v6323_v52 = vld [vmem:[#allocation7 + $0x62c] ss:$16 sps:$4 sm:$0xff]  }
 0x1fe   :  { %4539 = vmatpush2.bf16.msra.mxu0 %v6258_v53  ;;  %v6318_v53 = vld [vmem:[#allocation7 + $0x428] ss:$16 sps:$4 sm:$0xff]  }
 0x1ff   :  { %4580 = vmatpush2.bf16.msra.mxu1 %v6261_v55  ;;  %4540 = vmatprep.subr.bf16.mxu0 %v6266_v56  ;;  %v6321_v55 = vld [vmem:[#allocation7 + $0x628] ss:$16 sps:$4 sm:$0xff]   ;;  %v6326_v56 = vld [vmem:[#allocation7 + $0x40c] ss:$16 sps:$4 sm:$0xff]  }
 0x200   :  { %4581 = vmatprep.subr.bf16.mxu1 %v6269_v59  ;;  %v6329_v59 = vld [vmem:[#allocation7 + $0x60c] ss:$16 sps:$4 sm:$0xff]  }
 0x202   :  { %4541 = vmatpush2.bf16.msra.mxu0 %v6264_v60  ;;  %v6324_v60 = vld [vmem:[#allocation7 + $0x408] ss:$16 sps:$4 sm:$0xff]  }
 0x203   :  { %4582 = vmatpush2.bf16.msra.mxu1 %v6267_v63  ;;  %4542 = vmatprep.subr.bf16.mxu0 %v6272_v0  ;;  %v6327_v63 = vld [vmem:[#allocation7 + $0x608] ss:$16 sps:$4 sm:$0xff]   ;;  %v6332_v0 = vld [vmem:[#allocation7 + $0x5ec] ss:$16 sps:$4 sm:$0xff]  }
 0x204   :  { %4583 = vmatprep.subr.bf16.mxu1 %v6275_v1  ;;  %v6335_v1 = vld [vmem:[#allocation7 + $0x7ec] ss:$16 sps:$4 sm:$0xff]  }
 0x206   :  { %4543 = vmatpush2.bf16.msra.mxu0 %v6270_v2  ;;  %v6330_v2 = vld [vmem:[#allocation7 + $0x5e8] ss:$16 sps:$4 sm:$0xff]  }
 0x207   :  { %4584 = vmatpush2.bf16.msra.mxu1 %v6273_v4  ;;  %4544 = vmatprep.subr.bf16.mxu0 %v6278_v46  ;;  %v6333_v4 = vld [vmem:[#allocation7 + $0x7e8] ss:$16 sps:$4 sm:$0xff]   ;;  %v6338_v46 = vld [vmem:[#allocation7 + $0x5cc] ss:$16 sps:$4 sm:$0xff]  }
 0x208   :  { %4585 = vmatprep.subr.bf16.mxu1 %v6281_v17  ;;  %v6341_v17 = vld [vmem:[#allocation7 + $0x7cc] ss:$16 sps:$4 sm:$0xff]  }
 0x20a   :  { %4545 = vmatpush2.bf16.msra.mxu0 %v6276_v18  ;;  %v6336_v18 = vld [vmem:[#allocation7 + $0x5c8] ss:$16 sps:$4 sm:$0xff]  }
 0x20b   :  { %4586 = vmatpush2.bf16.msra.mxu1 %v6279_v5  ;;  %4596 = vmatprep.subr.bf16.mxu0 %v6284_v6  ;;  %v6339_v5 = vld [vmem:[#allocation7 + $0x7c8] ss:$16 sps:$4 sm:$0xff]   ;;  %v6344_v6 = vld [vmem:[#allocation7 + $0x5ac] ss:$16 sps:$4 sm:$0xff]  }
 0x20c   :  { %4637 = vmatprep.subr.bf16.mxu1 %v6287_v9  ;;  %v6347_v9 = vld [vmem:[#allocation7 + $0x7ac] ss:$16 sps:$4 sm:$0xff]  }
 0x20d   :  { %v4302_v23 = vpop.f32.mrf.mxu0  ;;  %4547 = vmatmul.mubr.bf16.vlgmr.msra.gmra.mxu0 %v6797_v20 }
 0x20e   :  { %v4343_v24 = vpop.f32.mrf.mxu1  ;;  %4588 = vmatmul.mubr.bf16.vlgmr.msra.gmra.mxu1 %v6801_v21  ;;  %v4303_v25 = vadd.f32 %v4302_v23, %v6884_v54  ;;  %4597 = vmatpush1.bf16.msra.mxu0 %v6282_v10  ;;  %v6342_v10 = vld [vmem:[#allocation7 + $0x5a8] ss:$16 sps:$4 sm:$0xff]  }
 0x20f   :  { %4638 = vmatpush1.bf16.msra.mxu1 %v6285_v11  ;;  %v4304_v26 = vpop.f32.mrf.mxu0  ;;  %4598 = vmatprep.subr.bf16.mxu0 %v6290_v13  ;;  %v6345_v11 = vld [vmem:[#allocation7 + $0x7a8] ss:$16 sps:$4 sm:$0xff]   ;;  %v6350_v13 = vld [vmem:[#allocation7 + $0x58c] ss:$16 sps:$4 sm:$0xff]  }
 0x210   :  { %v4345_v27 = vpop.f32.mrf.mxu1  ;;  %4639 = vmatprep.subr.bf16.mxu1 %v6293_v14  ;;  %v6894_v30 = vadd.f32 %v4343_v24, %v4303_v25  ;;  %v4305_v35 = vadd.f32 %v4304_v26, %v6889_v39  ;;  %4628 = vmatprep.mubr.bf16.mxu0 %v6807_v8  ;;  %v6300_v39 = vld [vmem:[#allocation7 + $0x488] ss:$16 sps:$4 sm:$0xff]   ;;  %v6353_v14 = vld [vmem:[#allocation7 + $0x78c] ss:$16 sps:$4 sm:$0xff]  }
 0x211   :  { %4669 = vmatprep.mubr.bf16.mxu1 %v6811_v15  ;;  %v4306_v20 = vpop.f32.mrf.mxu0  ;;  %v6303_v8 = vld [vmem:[#allocation7 + $0x688] ss:$16 sps:$4 sm:$0xff]   ;;  %v6308_v15 = vld [vmem:[#allocation7 + $0x46c] ss:$16 sps:$4 sm:$0xff]  }
 0x212   :  { %v4347_v21 = vpop.f32.mrf.mxu1  ;;  %v6899_v54 = vadd.f32 %v4345_v27, %v4305_v35  ;;  %4599 = vmatpush1.bf16.msra.mxu0 %v6288_v7  ;;  %v6348_v23 = vld [vmem:[#allocation7 + $0x588] ss:$16 sps:$4 sm:$0xff]   ;;  %v6356_v25 = vld [vmem:[#allocation7 + $0x56c] ss:$16 sps:$4 sm:$0xff]  }
 0x213   :  { %4640 = vmatpush1.bf16.msra.mxu1 %v6291_v16  ;;  %v4307_v38 = vpop.f32.mrf.mxu0  ;;  %4600 = vmatprep.subr.bf16.mxu0 %v6296_v28  ;;  %v6351_v24 = vld [vmem:[#allocation7 + $0x788] ss:$16 sps:$4 sm:$0xff]   ;;  %v6359_v7 = vld [vmem:[#allocation7 + $0x76c] ss:$16 sps:$4 sm:$0xff]  }
 0x214   :  { %v4348_v40 = vpop.f32.mrf.mxu1  ;;  %4641 = vmatprep.subr.bf16.mxu1 %v6299_v29  ;;  %v6354_v16 = vld [vmem:[#allocation7 + $0x568] ss:$16 sps:$4 sm:$0xff]   ;;  %v6362_v27 = vld [vmem:[#allocation7 + $0x54c] ss:$16 sps:$4 sm:$0xff]  }
 0x215   :  { %v6357_v26 = vld [vmem:[#allocation7 + $0x768] ss:$16 sps:$4 sm:$0xff]   ;;  %v6365_v28 = vld [vmem:[#allocation7 + $0x74c] ss:$16 sps:$4 sm:$0xff]  }
 0x216   :  { %4601 = vmatpush1.bf16.msra.mxu0 %v6294_v36  ;;  %v6360_v29 = vld [vmem:[#allocation7 + $0x548] ss:$16 sps:$4 sm:$0xff]   ;;  %v6368_v20 = vld [vmem:[#allocation7 + $0x52c] ss:$16 sps:$4 sm:$0xff]  }
 0x217   :  { %4642 = vmatpush1.bf16.msra.mxu1 %v6297_v22  ;;  %4602 = vmatprep.subr.bf16.mxu0 %v6302_v41  ;;  %v6363_v35 = vld [vmem:[#allocation7 + $0x748] ss:$16 sps:$4 sm:$0xff]   ;;  %v6371_v21 = vld [vmem:[#allocation7 + $0x72c] ss:$16 sps:$4 sm:$0xff]  }
 0x218   :  { %4643 = vmatprep.subr.bf16.mxu1 %v6305_v44  ;;  %v6366_v36 = vld [vmem:[#allocation7 + $0x528] ss:$16 sps:$4 sm:$0xff]   ;;  %v6374_v38 = vld [vmem:[#allocation7 + $0x50c] ss:$16 sps:$4 sm:$0xff]  }
 0x219   :  { %v6369_v22 = vld [vmem:[#allocation7 + $0x728] ss:$16 sps:$4 sm:$0xff]   ;;  %v6377_v40 = vld [vmem:[#allocation7 + $0x70c] ss:$16 sps:$4 sm:$0xff]  }
 0x21a   :  { %4603 = vmatpush1.bf16.msra.mxu0 %v6300_v39  ;;  %v6372_v41 = vld [vmem:[#allocation7 + $0x508] ss:$16 sps:$4 sm:$0xff]   ;;  %v6380_v39 = vld [vmem:[#allocation7 + $0x8ec] ss:$16 sps:$4 sm:$0xff]  }
 0x21b   :  { %4644 = vmatpush1.bf16.msra.mxu1 %v6303_v8  ;;  %4604 = vmatprep.subr.bf16.mxu0 %v6308_v15  ;;  %v6375_v44 = vld [vmem:[#allocation7 + $0x708] ss:$16 sps:$4 sm:$0xff]   ;;  %v6383_v8 = vld [vmem:[#allocation7 + $0xaec] ss:$16 sps:$4 sm:$0xff]  }
 0x21c   :  { %4645 = vmatprep.subr.bf16.mxu1 %v6311_v45  ;;  %v6378_v15 = vld [vmem:[#allocation7 + $0x8e8] ss:$16 sps:$4 sm:$0xff]  }
 0x21d   :  { %v6381_v45 = vld [vmem:[#allocation7 + $0xae8] ss:$16 sps:$4 sm:$0xff]  }
 0x21e   :  { %4605 = vmatpush1.bf16.msra.mxu0 %v6306_v47  ;;  %v6386_v47 = vld [vmem:[#allocation7 + $0x8cc] ss:$16 sps:$4 sm:$0xff]  }
 0x21f   :  { %4646 = vmatpush1.bf16.msra.mxu1 %v6309_v48  ;;  %4606 = vmatprep.subr.bf16.mxu0 %v6314_v49  ;;  %v6389_v48 = vld [vmem:[#allocation7 + $0xacc] ss:$16 sps:$4 sm:$0xff]  }
 0x220   :  { %4647 = vmatprep.subr.bf16.mxu1 %v6317_v57 }
 0x222   :  { %4607 = vmatpush1.bf16.msra.mxu0 %v6312_v50 }
 0x223   :  { %4648 = vmatpush1.bf16.msra.mxu1 %v6315_v58  ;;  %4608 = vmatprep.subr.bf16.mxu0 %v6320_v51  ;;  %v6384_v58 = vld [vmem:[#allocation7 + $0x8c8] ss:$16 sps:$4 sm:$0xff]  }
 0x224   :  { %4649 = vmatprep.subr.bf16.mxu1 %v6323_v52  ;;  %v6387_v51 = vld [vmem:[#allocation7 + $0xac8] ss:$16 sps:$4 sm:$0xff]  }
 0x226   :  { %4609 = vmatpush1.bf16.msra.mxu0 %v6318_v53 }
 0x227   :  { %4650 = vmatpush1.bf16.msra.mxu1 %v6321_v55  ;;  %4610 = vmatprep.subr.bf16.mxu0 %v6326_v56  ;;  %v6392_v55 = vld [vmem:[#allocation7 + $0x8ac] ss:$16 sps:$4 sm:$0xff]  }
 0x228   :  { %4651 = vmatprep.subr.bf16.mxu1 %v6329_v59  ;;  %v6395_v56 = vld [vmem:[#allocation7 + $0xaac] ss:$16 sps:$4 sm:$0xff]  }
 0x22a   :  { %4611 = vmatpush1.bf16.msra.mxu0 %v6324_v60 }
 0x22b   :  { %4652 = vmatpush1.bf16.msra.mxu1 %v6327_v63  ;;  %4612 = vmatprep.subr.bf16.mxu0 %v6332_v0  ;;  %v6390_v63 = vld [vmem:[#allocation7 + $0x8a8] ss:$16 sps:$4 sm:$0xff]  }
 0x22c   :  { %4653 = vmatprep.subr.bf16.mxu1 %v6335_v1  ;;  %v6393_v0 = vld [vmem:[#allocation7 + $0xaa8] ss:$16 sps:$4 sm:$0xff]  }
 0x22e   :  { %4613 = vmatpush2.bf16.msra.mxu0 %v6330_v2 }
 0x22f   :  { %4654 = vmatpush2.bf16.msra.mxu1 %v6333_v4  ;;  %4614 = vmatprep.subr.bf16.mxu0 %v6338_v46  ;;  %v6398_v4 = vld [vmem:[#allocation7 + $0x88c] ss:$16 sps:$4 sm:$0xff]  }
 0x230   :  { %4655 = vmatprep.subr.bf16.mxu1 %v6341_v17  ;;  %v6401_v46 = vld [vmem:[#allocation7 + $0xa8c] ss:$16 sps:$4 sm:$0xff]  }
 0x231   :  { %v6407_v17 = vld [vmem:[#allocation7 + $0xa6c] ss:$16 sps:$4 sm:$0xff]  }
 0x232   :  { %4615 = vmatpush2.bf16.msra.mxu0 %v6336_v18  ;;  %v6402_v18 = vld [vmem:[#allocation7 + $0x868] ss:$16 sps:$4 sm:$0xff]  }
 0x233   :  { %4656 = vmatpush2.bf16.msra.mxu1 %v6339_v5  ;;  %4616 = vmatprep.subr.bf16.mxu0 %v6344_v6  ;;  %v6405_v5 = vld [vmem:[#allocation7 + $0xa68] ss:$16 sps:$4 sm:$0xff]   ;;  %v6410_v6 = vld [vmem:[#allocation7 + $0x84c] ss:$16 sps:$4 sm:$0xff]  }
 0x234   :  { %4657 = vmatprep.subr.bf16.mxu1 %v6347_v9  ;;  %v6413_v9 = vld [vmem:[#allocation7 + $0xa4c] ss:$16 sps:$4 sm:$0xff]  }
 0x236   :  { %4617 = vmatpush2.bf16.msra.mxu0 %v6342_v10  ;;  %v6408_v10 = vld [vmem:[#allocation7 + $0x848] ss:$16 sps:$4 sm:$0xff]  }
 0x237   :  { %4658 = vmatpush2.bf16.msra.mxu1 %v6345_v11  ;;  %4618 = vmatprep.subr.bf16.mxu0 %v6350_v13  ;;  %v6411_v11 = vld [vmem:[#allocation7 + $0xa48] ss:$16 sps:$4 sm:$0xff]   ;;  %v6416_v13 = vld [vmem:[#allocation7 + $0x82c] ss:$16 sps:$4 sm:$0xff]  }
 0x238   :  { %4659 = vmatprep.subr.bf16.mxu1 %v6353_v14  ;;  %v6419_v14 = vld [vmem:[#allocation7 + $0xa2c] ss:$16 sps:$4 sm:$0xff]  }
 0x23a   :  { %4619 = vmatpush2.bf16.msra.mxu0 %v6348_v23  ;;  %v6414_v23 = vld [vmem:[#allocation7 + $0x828] ss:$16 sps:$4 sm:$0xff]  }
 0x23b   :  { %4660 = vmatpush2.bf16.msra.mxu1 %v6351_v24  ;;  %4620 = vmatprep.subr.bf16.mxu0 %v6356_v25  ;;  %v6417_v24 = vld [vmem:[#allocation7 + $0xa28] ss:$16 sps:$4 sm:$0xff]   ;;  %v6422_v25 = vld [vmem:[#allocation7 + $0x80c] ss:$16 sps:$4 sm:$0xff]  }
 0x23c   :  { %4661 = vmatprep.subr.bf16.mxu1 %v6359_v7  ;;  %v6425_v7 = vld [vmem:[#allocation7 + $0xa0c] ss:$16 sps:$4 sm:$0xff]  }
 0x23e   :  { %4621 = vmatpush2.bf16.msra.mxu0 %v6354_v16  ;;  %v6420_v16 = vld [vmem:[#allocation7 + $0x808] ss:$16 sps:$4 sm:$0xff]  }
 0x23f   :  { %4662 = vmatpush2.bf16.msra.mxu1 %v6357_v26  ;;  %4622 = vmatprep.subr.bf16.mxu0 %v6362_v27  ;;  %v6423_v26 = vld [vmem:[#allocation7 + $0xa08] ss:$16 sps:$4 sm:$0xff]   ;;  %v6428_v27 = vld [vmem:[#allocation7 + $0x9ec] ss:$16 sps:$4 sm:$0xff]  }
 0x240   :  { %4663 = vmatprep.subr.bf16.mxu1 %v6365_v28  ;;  %v6431_v28 = vld [vmem:[#allocation7 + $0xbec] ss:$16 sps:$4 sm:$0xff]  }
 0x242   :  { %4623 = vmatpush2.bf16.msra.mxu0 %v6360_v29  ;;  %v6426_v29 = vld [vmem:[#allocation7 + $0x9e8] ss:$16 sps:$4 sm:$0xff]  }
 0x243   :  { %4664 = vmatpush2.bf16.msra.mxu1 %v6363_v35  ;;  %4624 = vmatprep.subr.bf16.mxu0 %v6368_v20  ;;  %v6429_v35 = vld [vmem:[#allocation7 + $0xbe8] ss:$16 sps:$4 sm:$0xff]   ;;  %v6434_v20 = vld [vmem:[#allocation7 + $0x9cc] ss:$16 sps:$4 sm:$0xff]  }
 0x244   :  { %4665 = vmatprep.subr.bf16.mxu1 %v6371_v21  ;;  %v6437_v21 = vld [vmem:[#allocation7 + $0xbcc] ss:$16 sps:$4 sm:$0xff]  }
 0x246   :  { %4625 = vmatpush2.bf16.msra.mxu0 %v6366_v36  ;;  %v6432_v36 = vld [vmem:[#allocation7 + $0x9c8] ss:$16 sps:$4 sm:$0xff]  }
 0x247   :  { %4666 = vmatpush2.bf16.msra.mxu1 %v6369_v22  ;;  %4626 = vmatprep.subr.bf16.mxu0 %v6374_v38  ;;  %v6435_v22 = vld [vmem:[#allocation7 + $0xbc8] ss:$16 sps:$4 sm:$0xff]   ;;  %v6440_v38 = vld [vmem:[#allocation7 + $0x9ac] ss:$16 sps:$4 sm:$0xff]  }
 0x248   :  { %4667 = vmatprep.subr.bf16.mxu1 %v6377_v40  ;;  %v6443_v40 = vld [vmem:[#allocation7 + $0xbac] ss:$16 sps:$4 sm:$0xff]  }
 0x24a   :  { %4627 = vmatpush2.bf16.msra.mxu0 %v6372_v41  ;;  %v6438_v41 = vld [vmem:[#allocation7 + $0x9a8] ss:$16 sps:$4 sm:$0xff]  }
 0x24b   :  { %4668 = vmatpush2.bf16.msra.mxu1 %v6375_v44  ;;  %4678 = vmatprep.subr.bf16.mxu0 %v6380_v39  ;;  %v6441_v44 = vld [vmem:[#allocation7 + $0xba8] ss:$16 sps:$4 sm:$0xff]   ;;  %v6446_v39 = vld [vmem:[#allocation7 + $0x98c] ss:$16 sps:$4 sm:$0xff]  }
 0x24c   :  { %4719 = vmatprep.subr.bf16.mxu1 %v6383_v8  ;;  %v6449_v8 = vld [vmem:[#allocation7 + $0xb8c] ss:$16 sps:$4 sm:$0xff]  }
 0x24d   :  { %v4384_v49 = vpop.f32.mrf.mxu0  ;;  %4629 = vmatmul.mubr.bf16.vlgmr.msra.gmra.mxu0 %v6819_v31 }
 0x24e   :  { %v4425_v57 = vpop.f32.mrf.mxu1  ;;  %4670 = vmatmul.mubr.bf16.vlgmr.msra.gmra.mxu1 %v6823_v32  ;;  %v4385_v50 = vadd.f32 %v4384_v49, %v6894_v30  ;;  %4679 = vmatpush1.bf16.msra.mxu0 %v6378_v15  ;;  %v6444_v15 = vld [vmem:[#allocation7 + $0x988] ss:$16 sps:$4 sm:$0xff]  }
 0x24f   :  { %4720 = vmatpush1.bf16.msra.mxu1 %v6381_v45  ;;  %v4386_v52 = vpop.f32.mrf.mxu0  ;;  %4680 = vmatprep.subr.bf16.mxu0 %v6386_v47  ;;  %v6447_v45 = vld [vmem:[#allocation7 + $0xb88] ss:$16 sps:$4 sm:$0xff]   ;;  %v6452_v47 = vld [vmem:[#allocation7 + $0x96c] ss:$16 sps:$4 sm:$0xff]  }
 0x250   :  { %v4427_v53 = vpop.f32.mrf.mxu1  ;;  %4721 = vmatprep.subr.bf16.mxu1 %v6389_v48  ;;  %v6904_v59 = vadd.f32 %v4425_v57, %v4385_v50  ;;  %v4387_v60 = vadd.f32 %v4386_v52, %v6899_v54  ;;  %4710 = vmatprep.mubr.bf16.mxu0 %v6831_v37  ;;  %v6396_v54 = vld [vmem:[#allocation7 + $0x888] ss:$16 sps:$4 sm:$0xff]   ;;  %v6455_v48 = vld [vmem:[#allocation7 + $0xb6c] ss:$16 sps:$4 sm:$0xff]  }
 0x251   :  { %4751 = vmatprep.mubr.bf16.mxu1 %v6835_v19  ;;  %v4388_v31 = vpop.f32.mrf.mxu0  ;;  %v6399_v37 = vld [vmem:[#allocation7 + $0xa88] ss:$16 sps:$4 sm:$0xff]   ;;  %v6404_v19 = vld [vmem:[#allocation7 + $0x86c] ss:$16 sps:$4 sm:$0xff]  }
 0x252   :  { %v4429_v32 = vpop.f32.mrf.mxu1  ;;  %v6909_v30 = vadd.f32 %v4427_v53, %v4387_v60  ;;  %4681 = vmatpush1.bf16.msra.mxu0 %v6384_v58  ;;  %v6450_v49 = vld [vmem:[#allocation7 + $0x968] ss:$16 sps:$4 sm:$0xff]   ;;  %v6458_v50 = vld [vmem:[#allocation7 + $0x94c] ss:$16 sps:$4 sm:$0xff]   ;;  %v4844_v31 = vlaneseq }
 0x253   :  { %4722 = vmatpush1.bf16.msra.mxu1 %v6387_v51  ;;  %v4389_v1 = vpop.f32.mrf.mxu0  ;;  %4682 = vmatprep.subr.bf16.mxu0 %v6392_v55  ;;  %v6453_v57 = vld [vmem:[#allocation7 + $0xb68] ss:$16 sps:$4 sm:$0xff]   ;;  %v6461_v58 = vld [vmem:[#allocation7 + $0xb4c] ss:$16 sps:$4 sm:$0xff]  }
 0x254   :  { %v4430_v2 = vpop.f32.mrf.mxu1  ;;  %4723 = vmatprep.subr.bf16.mxu1 %v6395_v56  ;;  %v6456_v51 = vld [vmem:[#allocation7 + $0x948] ss:$16 sps:$4 sm:$0xff]   ;;  %v6464_v53 = vld [vmem:[#allocation7 + $0x92c] ss:$16 sps:$4 sm:$0xff]  }
 0x255   :  { %v6459_v52 = vld [vmem:[#allocation7 + $0xb48] ss:$16 sps:$4 sm:$0xff]   ;;  %v6467_v55 = vld [vmem:[#allocation7 + $0xb2c] ss:$16 sps:$4 sm:$0xff]   ;;  %v6911_v2 = vshrl.u32 %v4844_v31, 7 }
 0x256   :  { %4683 = vmatpush1.bf16.msra.mxu0 %v6390_v63  ;;  %v6462_v56 = vld [vmem:[#allocation7 + $0x928] ss:$16 sps:$4 sm:$0xff]   ;;  %v6470_v32 = vld [vmem:[#allocation7 + $0x90c] ss:$16 sps:$4 sm:$0xff]  }
 0x257   :  { %4724 = vmatpush1.bf16.msra.mxu1 %v6393_v0  ;;  %4684 = vmatprep.subr.bf16.mxu0 %v6398_v4  ;;  %v6465_v60 = vld [vmem:[#allocation7 + $0xb28] ss:$16 sps:$4 sm:$0xff]   ;;  %v6473_v63 = vld [vmem:[#allocation7 + $0xb0c] ss:$16 sps:$4 sm:$0xff]  }
 0x258   :  { %4725 = vmatprep.subr.bf16.mxu1 %v6401_v46  ;;  %v6468_v0 = vld [vmem:[#allocation7 + $0x908] ss:$16 sps:$4 sm:$0xff]   ;;  %v6476_v4 = vld [vmem:[#allocation7 + $0xcec] ss:$16 sps:$4 sm:$0xff]  }
 0x259   :  { %v6471_v1 = vld [vmem:[#allocation7 + $0xb08] ss:$16 sps:$4 sm:$0xff]   ;;  %v6479_v46 = vld [vmem:[#allocation7 + $0xeec] ss:$16 sps:$4 sm:$0xff]  }
 0x25a   :  { %4685 = vmatpush1.bf16.msra.mxu0 %v6396_v54  ;;  %v4846_v54 = vsub.s32 0, %v6911_v2  ;;  %v6513_v31 = vld [vmem:[#allocation7 + $0xe28] ss:$16 sps:$4 sm:$0xff]  }
 0x25b   :  { %4726 = vmatpush1.bf16.msra.mxu1 %v6399_v37  ;;  %4686 = vmatprep.subr.bf16.mxu0 %v6404_v19  ;;  %v6474_v37 = vld [vmem:[#allocation7 + $0xce8] ss:$16 sps:$4 sm:$0xff]  }
 0x25c   :  { %4727 = vmatprep.subr.bf16.mxu1 %v6407_v17  ;;  %v6477_v19 = vld [vmem:[#allocation7 + $0xee8] ss:$16 sps:$4 sm:$0xff]   ;;  %v6914_v17 = vld [vmem:[#allocation10] sm:$0xf] }
 0x25e   :  { %4687 = vmatpush1.bf16.msra.mxu0 %v6402_v18  ;;  %v6482_v18 = vld [vmem:[#allocation7 + $0xccc] ss:$16 sps:$4 sm:$0xff]  }
 0x25f   :  { %4728 = vmatpush1.bf16.msra.mxu1 %v6405_v5  ;;  %4688 = vmatprep.subr.bf16.mxu0 %v6410_v6  ;;  %v6485_v5 = vld [vmem:[#allocation7 + $0xecc] ss:$16 sps:$4 sm:$0xff]   ;;  %v4850_v6 = vsub.s32 1, %v6911_v2 }
 0x260   :  { %4729 = vmatprep.subr.bf16.mxu1 %v6413_v9 }
 0x262   :  { %4689 = vmatpush1.bf16.msra.mxu0 %v6408_v10 }
 0x263   :  { %4730 = vmatpush1.bf16.msra.mxu1 %v6411_v11  ;;  %4690 = vmatprep.subr.bf16.mxu0 %v6416_v13  ;;  %v4847_v13 = vrot.slane %v6914_v17, %v4846_v54 }
 0x264   :  { %4731 = vmatprep.subr.bf16.mxu1 %v6419_v14  ;;  %v6480_v14 = vld [vmem:[#allocation7 + $0xcc8] ss:$16 sps:$4 sm:$0xff]  }
 0x266   :  { %4691 = vmatpush1.bf16.msra.mxu0 %v6414_v23  ;;  %v6483_v23 = vld [vmem:[#allocation7 + $0xec8] ss:$16 sps:$4 sm:$0xff]  }
 0x267   :  { %4732 = vmatpush1.bf16.msra.mxu1 %v6417_v24  ;;  %4692 = vmatprep.subr.bf16.mxu0 %v6422_v25 }
 0x268   :  { %4733 = vmatprep.subr.bf16.mxu1 %v6425_v7  ;;  %v6488_v7 = vld [vmem:[#allocation7 + $0xcac] ss:$16 sps:$4 sm:$0xff]  }
 0x26a   :  { %4693 = vmatpush1.bf16.msra.mxu0 %v6420_v16  ;;  %v6491_v16 = vld [vmem:[#allocation7 + $0xeac] ss:$16 sps:$4 sm:$0xff]  }
 0x26b   :  { %4734 = vmatpush1.bf16.msra.mxu1 %v6423_v26  ;;  %4694 = vmatprep.subr.bf16.mxu0 %v6428_v27 }
 0x26c   :  { %4735 = vmatprep.subr.bf16.mxu1 %v6431_v28 }
 0x26e   :  { %4695 = vmatpush2.bf16.msra.mxu0 %v6426_v29 }
 0x26f   :  { %4736 = vmatpush2.bf16.msra.mxu1 %v6429_v35  ;;  %4696 = vmatprep.subr.bf16.mxu0 %v6434_v20  ;;  %v6486_v20 = vld [vmem:[#allocation7 + $0xca8] ss:$16 sps:$4 sm:$0xff]  }
 0x270   :  { %4737 = vmatprep.subr.bf16.mxu1 %v6437_v21  ;;  %v6489_v21 = vld [vmem:[#allocation7 + $0xea8] ss:$16 sps:$4 sm:$0xff]  }
 0x272   :  { %4697 = vmatpush2.bf16.msra.mxu0 %v6432_v36 }
 0x273   :  { %4738 = vmatpush2.bf16.msra.mxu1 %v6435_v22  ;;  %4698 = vmatprep.subr.bf16.mxu0 %v6440_v38  ;;  %v6497_v38 = vld [vmem:[#allocation7 + $0xe8c] ss:$16 sps:$4 sm:$0xff]  }
 0x274   :  { %4739 = vmatprep.subr.bf16.mxu1 %v6443_v40 }
 0x276   :  { %4699 = vmatpush2.bf16.msra.mxu0 %v6438_v41 }
 0x277   :  { %4740 = vmatpush2.bf16.msra.mxu1 %v6441_v44  ;;  %4700 = vmatprep.subr.bf16.mxu0 %v6446_v39  ;;  %v6492_v39 = vld [vmem:[#allocation7 + $0xc88] ss:$16 sps:$4 sm:$0xff]  }
 0x278   :  { %4741 = vmatprep.subr.bf16.mxu1 %v6449_v8  ;;  %v6495_v8 = vld [vmem:[#allocation7 + $0xe88] ss:$16 sps:$4 sm:$0xff]  }
 0x27a   :  { %4701 = vmatpush2.bf16.msra.mxu0 %v6444_v15  ;;  %v6500_v15 = vld [vmem:[#allocation7 + $0xc6c] ss:$16 sps:$4 sm:$0xff]  }
 0x27b   :  { %4742 = vmatpush2.bf16.msra.mxu1 %v6447_v45  ;;  %4702 = vmatprep.subr.bf16.mxu0 %v6452_v47  ;;  %v6503_v45 = vld [vmem:[#allocation7 + $0xe6c] ss:$16 sps:$4 sm:$0xff]  }
 0x27c   :  { %4743 = vmatprep.subr.bf16.mxu1 %v6455_v48 }
 0x27e   :  { %4703 = vmatpush2.bf16.msra.mxu0 %v6450_v49  ;;  %v6498_v49 = vld [vmem:[#allocation7 + $0xc68] ss:$16 sps:$4 sm:$0xff]  }
 0x27f   :  { %4744 = vmatpush2.bf16.msra.mxu1 %v6453_v57  ;;  %4704 = vmatprep.subr.bf16.mxu0 %v6458_v50  ;;  %v6501_v57 = vld [vmem:[#allocation7 + $0xe68] ss:$16 sps:$4 sm:$0xff]  }
 0x280   :  { %4745 = vmatprep.subr.bf16.mxu1 %v6461_v58  ;;  %v6506_v58 = vld [vmem:[#allocation7 + $0xc4c] ss:$16 sps:$4 sm:$0xff]  }
 0x282   :  { %4705 = vmatpush2.bf16.msra.mxu0 %v6456_v51  ;;  %v6509_v51 = vld [vmem:[#allocation7 + $0xe4c] ss:$16 sps:$4 sm:$0xff]  }
 0x283   :  { %4746 = vmatpush2.bf16.msra.mxu1 %v6459_v52  ;;  %4706 = vmatprep.subr.bf16.mxu0 %v6464_v53  ;;  %v6504_v52 = vld [vmem:[#allocation7 + $0xc48] ss:$16 sps:$4 sm:$0xff]  }
 0x284   :  { %4747 = vmatprep.subr.bf16.mxu1 %v6467_v55  ;;  %v6507_v53 = vld [vmem:[#allocation7 + $0xe48] ss:$16 sps:$4 sm:$0xff]   ;;  %v6512_v55 = vld [vmem:[#allocation7 + $0xc2c] ss:$16 sps:$4 sm:$0xff]  }
 0x286   :  { %4707 = vmatpush2.bf16.msra.mxu0 %v6462_v56  ;;  %v6515_v56 = vld [vmem:[#allocation7 + $0xe2c] ss:$16 sps:$4 sm:$0xff]  }
 0x287   :  { %4748 = vmatpush2.bf16.msra.mxu1 %v6465_v60  ;;  %4708 = vmatprep.subr.bf16.mxu0 %v6470_v32  ;;  %v6510_v60 = vld [vmem:[#allocation7 + $0xc28] ss:$16 sps:$4 sm:$0xff]   ;;  %v6518_v32 = vld [vmem:[#allocation7 + $0xc0c] ss:$16 sps:$4 sm:$0xff]  }
 0x288   :  { %4749 = vmatprep.subr.bf16.mxu1 %v6473_v63  ;;  %v6521_v63 = vld [vmem:[#allocation7 + $0xe0c] ss:$16 sps:$4 sm:$0xff]  }
 0x28a   :  { %4709 = vmatpush2.bf16.msra.mxu0 %v6468_v0  ;;  %v6516_v0 = vld [vmem:[#allocation7 + $0xc08] ss:$16 sps:$4 sm:$0xff]  }
 0x28b   :  { %4750 = vmatpush2.bf16.msra.mxu1 %v6471_v1  ;;  %4760 = vmatprep.subr.bf16.mxu0 %v6476_v4  ;;  %v6519_v1 = vld [vmem:[#allocation7 + $0xe08] ss:$16 sps:$4 sm:$0xff]   ;;  %v6524_v4 = vld [vmem:[#allocation7 + $0xdec] ss:$16 sps:$4 sm:$0xff]  }
 0x28c   :  { %4801 = vmatprep.subr.bf16.mxu1 %v6479_v46  ;;  %v6527_v46 = vld [vmem:[#allocation7 + $0xfec] ss:$16 sps:$4 sm:$0xff]  }
 0x28d   :  { %v4466_v9 = vpop.f32.mrf.mxu0  ;;  %4711 = vmatmul.mubr.bf16.vlgmr.msra.gmra.mxu0 %v6851_v61  ;;  %v4851_v61 = vrot.slane %v6914_v17, %v4850_v6 }
 0x28e   :  { %v4507_v10 = vpop.f32.mrf.mxu1  ;;  %4752 = vmatmul.mubr.bf16.vlgmr.msra.gmra.mxu1 %v6855_v62  ;;  %v4467_v11 = vadd.f32 %v4466_v9, %v6904_v59  ;;  %4761 = vmatpush1.bf16.msra.mxu0 %v6474_v37  ;;  %v6925_v62 = vld [vmem:[#allocation11] sm:$0xf]  ;;  %v6525_v37 = vld [vmem:[#allocation7 + $0xfe8] ss:$16 sps:$4 sm:$0xff]   ;;  %v6536_v9 = vld [vmem:[#allocation7 + $0xdac] ss:$16 sps:$4 sm:$0xff]  }
 0x28f   :  { %4802 = vmatpush1.bf16.msra.mxu1 %v6477_v19  ;;  %v4468_v24 = vpop.f32.mrf.mxu0  ;;  %4762 = vmatprep.subr.bf16.mxu0 %v6482_v18  ;;  %v4881_v41 = vrot.slane %v6925_v62, %v4850_v6  ;;  %v6530_v19 = vld [vmem:[#allocation7 + $0xdcc] ss:$16 sps:$4 sm:$0xff]   ;;  %v6531_v6 = vld [vmem:[#allocation7 + $0xfc8] ss:$16 sps:$4 sm:$0xff]  }
 0x290   :  { %v4509_v25 = vpop.f32.mrf.mxu1  ;;  %4803 = vmatprep.subr.bf16.mxu1 %v6485_v5  ;;  %v4508_v26 = vadd.f32 %v4507_v10, %v4467_v11  ;;  %v4469_v27 = vadd.f32 %v4468_v24, %v6909_v30  ;;  %4792 = vmatprep.mubr.bf16.mxu0 %v6859_v3  ;;  %v6494_v30 = vld [vmem:[#allocation7 + $0xc8c] ss:$16 sps:$4 sm:$0xff]   ;;  %v4877_v3 = vrot.slane %v6925_v62, %v4846_v54  ;;  %v6522_v54 = vld [vmem:[#allocation7 + $0xde8] ss:$16 sps:$4 sm:$0xff]  }
 0x291   :  { %4833 = vmatprep.mubr.bf16.mxu1 %v6863_v33  ;;  %v4470_v59 = vpop.f32.mrf.mxu0  ;;  %v6533_v18 = vld [vmem:[#allocation7 + $0xfcc] ss:$16 sps:$4 sm:$0xff]   ;;  %v6528_v5 = vld [vmem:[#allocation7 + $0xdc8] ss:$16 sps:$4 sm:$0xff]  }
 0x292   :  { %v4511_v28 = vpop.f32.mrf.mxu1  ;;  %v4864_v29 = vadd.f32 %v4847_v13, %v4508_v26  ;;  %v4510_v35 = vadd.f32 %v4509_v25, %v4469_v27  ;;  %4763 = vmatpush1.bf16.msra.mxu0 %v6480_v14  ;;  %v6539_v10 = vld [vmem:[#allocation7 + $0xfac] ss:$16 sps:$4 sm:$0xff]   ;;  %v6534_v11 = vld [vmem:[#allocation7 + $0xda8] ss:$16 sps:$4 sm:$0xff]  }
 0x293   :  { %4804 = vmatpush1.bf16.msra.mxu1 %v6483_v23  ;;  %v4471_v36 = vpop.f32.mrf.mxu0  ;;  %4764 = vmatprep.subr.bf16.mxu0 %v6488_v7  ;;  %v6537_v13 = vld [vmem:[#allocation7 + $0xfa8] ss:$16 sps:$4 sm:$0xff]   ;;  %v6542_v14 = vld [vmem:[#allocation7 + $0xd8c] ss:$16 sps:$4 sm:$0xff]  }
 0x294   :  { %v4512_v22 = vpop.f32.mrf.mxu1  ;;  %4805 = vmatprep.subr.bf16.mxu1 %v6491_v16  ;;  %v4868_v40 = vmax.f32 %v4864_v29, 0.0  ;;  %v4865_v33 = vadd.f32 %v4851_v61, %v4510_v35  ;;  %v6545_v23 = vld [vmem:[#allocation7 + $0xf8c] ss:$16 sps:$4 sm:$0xff]   ;;  %v6540_v24 = vld [vmem:[#allocation7 + $0xd88] ss:$16 sps:$4 sm:$0xff]  }
 0x295   :  { %v6543_v25 = vld [vmem:[#allocation7 + $0xf88] ss:$16 sps:$4 sm:$0xff]   ;;  %v6548_v7 = vld [vmem:[#allocation7 + $0xd6c] ss:$16 sps:$4 sm:$0xff]  }
 0x296   :  { %v4869_v44 = vmax.f32 %v4865_v33, 0.0  ;;  %4765 = vmatpush1.bf16.msra.mxu0 %v6486_v20  ;;  %v4894_v47 = vmul.f32 %v4877_v3, %v4868_v40  ;;  %v6551_v16 = vld [vmem:[#allocation7 + $0xf6c] ss:$16 sps:$4 sm:$0xff]   ;;  %v6546_v26 = vld [vmem:[#allocation7 + $0xd68] ss:$16 sps:$4 sm:$0xff]  }
 0x297   :  { %4806 = vmatpush1.bf16.msra.mxu1 %v6489_v21  ;;  %4766 = vmatprep.subr.bf16.mxu0 %v6494_v30  ;;  %v6549_v27 = vld [vmem:[#allocation7 + $0xf68] ss:$16 sps:$4 sm:$0xff]   ;;  %v6554_v61 = vld [vmem:[#allocation7 + $0xd4c] ss:$16 sps:$4 sm:$0xff]  }
 0x298   :  { %4807 = vmatprep.subr.bf16.mxu1 %v6497_v38  ;;  %v4895_v48 = vmul.f32 %v4881_v41, %v4869_v44  ;;  %v6557_v59 = vld [vmem:[#allocation7 + $0xf4c] ss:$16 sps:$4 sm:$0xff]   ;;  %v6552_v28 = vld [vmem:[#allocation7 + $0xd48] ss:$16 sps:$4 sm:$0xff]  }
 0x299   :  { %v6555_v29 = vld [vmem:[#allocation7 + $0xf48] ss:$16 sps:$4 sm:$0xff]   ;;  %v6560_v35 = vld [vmem:[#allocation7 + $0xd2c] ss:$16 sps:$4 sm:$0xff]  }
 0x29a   :  { %4767 = vmatpush1.bf16.msra.mxu0 %v6492_v39  ;;  %v6929_v50 = vadd.f32 %v4895_v48, %v4894_v47  ;;  %v6563_v20 = vld [vmem:[#allocation7 + $0xf2c] ss:$16 sps:$4 sm:$0xff]   ;;  %v6558_v21 = vld [vmem:[#allocation7 + $0xd28] ss:$16 sps:$4 sm:$0xff]  }
 0x29b   :  { %4808 = vmatpush1.bf16.msra.mxu1 %v6495_v8  ;;  %4768 = vmatprep.subr.bf16.mxu0 %v6500_v15  ;;  %v6561_v36 = vld [vmem:[#allocation7 + $0xf28] ss:$16 sps:$4 sm:$0xff]   ;;  %v6566_v22 = vld [vmem:[#allocation7 + $0xd0c] ss:$16 sps:$4 sm:$0xff]  }
 0x29c   :  { %4809 = vmatprep.subr.bf16.mxu1 %v6503_v45  ;;  %v6569_v30 = vld [vmem:[#allocation7 + $0xf0c] ss:$16 sps:$4 sm:$0xff]   ;;  %v6564_v38 = vld [vmem:[#allocation7 + $0xd08] ss:$16 sps:$4 sm:$0xff]  }
 0x29d   :  { %v6567_v40 = vld [vmem:[#allocation7 + $0xf08] ss:$16 sps:$4 sm:$0xff]  }
 0x29e   :  { %4769 = vmatpush1.bf16.msra.mxu0 %v6498_v49 }
 0x29f   :  { %4810 = vmatpush1.bf16.msra.mxu1 %v6501_v57  ;;  %4770 = vmatprep.subr.bf16.mxu0 %v6506_v58 }
 0x2a0   :  { %4811 = vmatprep.subr.bf16.mxu1 %v6509_v51 }
 0x2a2   :  { %4771 = vmatpush1.bf16.msra.mxu0 %v6504_v52 }
 0x2a3   :  { %4812 = vmatpush1.bf16.msra.mxu1 %v6507_v53  ;;  %4772 = vmatprep.subr.bf16.mxu0 %v6512_v55 }
 0x2a4   :  { %4813 = vmatprep.subr.bf16.mxu1 %v6515_v56 }
 0x2a6   :  { %4773 = vmatpush1.bf16.msra.mxu0 %v6510_v60 }
 0x2a7   :  { %4814 = vmatpush1.bf16.msra.mxu1 %v6513_v31  ;;  %4774 = vmatprep.subr.bf16.mxu0 %v6518_v32 }
 0x2a8   :  { %4815 = vmatprep.subr.bf16.mxu1 %v6521_v63 }
 0x2aa   :  { %4775 = vmatpush1.bf16.msra.mxu0 %v6516_v0 }
 0x2ab   :  { %4816 = vmatpush1.bf16.msra.mxu1 %v6519_v1  ;;  %4776 = vmatprep.subr.bf16.mxu0 %v6524_v4 }
 0x2ac   :  { %4817 = vmatprep.subr.bf16.mxu1 %v6527_v46 }
 0x2ae   :  { %4777 = vmatpush2.bf16.msra.mxu0 %v6522_v54 }
 0x2af   :  { %4818 = vmatpush2.bf16.msra.mxu1 %v6525_v37  ;;  %4778 = vmatprep.subr.bf16.mxu0 %v6530_v19 }
 0x2b0   :  { %4819 = vmatprep.subr.bf16.mxu1 %v6533_v18 }
 0x2b2   :  { %4779 = vmatpush2.bf16.msra.mxu0 %v6528_v5  ;;  %v4854_v5 = vsub.s32 2, %v6911_v2 }
 0x2b3   :  { %4820 = vmatpush2.bf16.msra.mxu1 %v6531_v6  ;;  %4780 = vmatprep.subr.bf16.mxu0 %v6536_v9  ;;  %v4858_v9 = vsub.s32 3, %v6911_v2 }
 0x2b4   :  { %4821 = vmatprep.subr.bf16.mxu1 %v6539_v10 }
 0x2b6   :  { %4781 = vmatpush2.bf16.msra.mxu0 %v6534_v11 }
 0x2b7   :  { %4822 = vmatpush2.bf16.msra.mxu1 %v6537_v13  ;;  %4782 = vmatprep.subr.bf16.mxu0 %v6542_v14 }
 0x2b8   :  { %4823 = vmatprep.subr.bf16.mxu1 %v6545_v23  ;;  %v4855_v23 = vrot.slane %v6914_v17, %v4854_v5 }
 0x2ba   :  { %4783 = vmatpush2.bf16.msra.mxu0 %v6540_v24 }
 0x2bb   :  { %4824 = vmatpush2.bf16.msra.mxu1 %v6543_v25  ;;  %4784 = vmatprep.subr.bf16.mxu0 %v6548_v7 }
 0x2bc   :  { %4825 = vmatprep.subr.bf16.mxu1 %v6551_v16 }
 0x2be   :  { %4785 = vmatpush2.bf16.msra.mxu0 %v6546_v26  ;;  %v4859_v26 = vrot.slane %v6914_v17, %v4858_v9  ;;  %v5581_v17 = vld [vmem:[#allocation2] ss:$0 sm:$0xff] }
 0x2bf   :  { %4826 = vmatpush2.bf16.msra.mxu1 %v6549_v27  ;;  %4786 = vmatprep.subr.bf16.mxu0 %v6554_v61 }
 0x2c0   :  { %4827 = vmatprep.subr.bf16.mxu1 %v6557_v59 }
 0x2c2   :  { %4787 = vmatpush2.bf16.msra.mxu0 %v6552_v28 }
 0x2c3   :  { %4828 = vmatpush2.bf16.msra.mxu1 %v6555_v29  ;;  %4788 = vmatprep.subr.bf16.mxu0 %v6560_v35  ;;  %v4885_v29 = vrot.slane %v6925_v62, %v4854_v5 }
 0x2c4   :  { %4829 = vmatprep.subr.bf16.mxu1 %v6563_v20 }
 0x2c6   :  { %4789 = vmatpush2.bf16.msra.mxu0 %v6558_v21 }
 0x2c7   :  { %4830 = vmatpush2.bf16.msra.mxu1 %v6561_v36  ;;  %4790 = vmatprep.subr.bf16.mxu0 %v6566_v22  ;;  %v4889_v36 = vrot.slane %v6925_v62, %v4858_v9 }
 0x2c8   :  { %4831 = vmatprep.subr.bf16.mxu1 %v6569_v30 }
 0x2ca   :  { %4791 = vmatpush2.bf16.msra.mxu0 %v6564_v38 }
 0x2cb   :  { %4832 = vmatpush2.bf16.msra.mxu1 %v6567_v40 }
 0x2cd   :  { %v4548_v3 = vpop.f32.mrf.mxu0  ;;  %4793 = vmatmul.mubr.bf16.vlgmr.msra.gmra.mxu0 %v6875_v42 }
 0x2ce   :  { %v4589_v33 = vpop.f32.mrf.mxu1  ;;  %4834 = vmatmul.mubr.bf16.vlgmr.msra.gmra.mxu1 %v6879_v43  ;;  %v4549_v41 = vadd.f32 %v4548_v3, %v6867_v34 }
 0x2cf   :  { %v4550_v44 = vpop.f32.mrf.mxu0 }
 0x2d0   :  { %v4591_v39 = vpop.f32.mrf.mxu1  ;;  %v4590_v8 = vadd.f32 %v4589_v33, %v4549_v41  ;;  %v4551_v15 = vadd.f32 %v4550_v44, %v6869_v12 }
 0x2d1   :  { %v4552_v45 = vpop.f32.mrf.mxu0 }
 0x2d2   :  { %v4593_v47 = vpop.f32.mrf.mxu1  ;;  %v4592_v48 = vadd.f32 %v4591_v39, %v4551_v15 }
 0x2d3   :  { %v4553_v49 = vpop.f32.mrf.mxu0 }
 0x2d4   :  { %v4594_v57 = vpop.f32.mrf.mxu1 }
 0x30d   :  { %v4630_v58 = vpop.f32.mrf.mxu0 }
 0x30e   :  { %v4671_v51 = vpop.f32.mrf.mxu1  ;;  %v4631_v52 = vadd.f32 %v4630_v58, %v4590_v8 }
 0x30f   :  { %v4632_v53 = vpop.f32.mrf.mxu0 }
 0x310   :  { %v4673_v55 = vpop.f32.mrf.mxu1  ;;  %v4672_v42 = vadd.f32 %v4671_v51, %v4631_v52  ;;  %v4633_v56 = vadd.f32 %v4632_v53, %v4592_v48 }
 0x311   :  { %v4634_v43 = vpop.f32.mrf.mxu0 }
 0x312   :  { %v4675_v60 = vpop.f32.mrf.mxu1  ;;  %v4674_v34 = vadd.f32 %v4673_v55, %v4633_v56 }
 0x313   :  { %v4635_v31 = vpop.f32.mrf.mxu0 }
 0x314   :  { %v4676_v32 = vpop.f32.mrf.mxu1 }
 0x34d   :  { %v4712_v63 = vpop.f32.mrf.mxu0 }
 0x34e   :  { %v4753_v0 = vpop.f32.mrf.mxu1  ;;  %v4713_v19 = vadd.f32 %v4712_v63, %v4672_v42 }
 0x34f   :  { %v4714_v12 = vpop.f32.mrf.mxu0 }
 0x350   :  { %v4755_v1 = vpop.f32.mrf.mxu1  ;;  %v4715_v18 = vadd.f32 %v4714_v12, %v4674_v34  ;;  %v4754_v6 = vadd.f32 %v4753_v0, %v4713_v19 }
 0x351   :  { %v4716_v4 = vpop.f32.mrf.mxu0 }
 0x352   :  { %v4757_v46 = vpop.f32.mrf.mxu1  ;;  %v4756_v13 = vadd.f32 %v4755_v1, %v4715_v18 }
 0x353   :  { %v4717_v54 = vpop.f32.mrf.mxu0 }
 0x354   :  { %v4758_v37 = vpop.f32.mrf.mxu1 }
 0x38d   :  { %v4794_v10 = vpop.f32.mrf.mxu0 }
 0x38e   :  { %v4835_v11 = vpop.f32.mrf.mxu1  ;;  %v4795_v14 = vadd.f32 %v4794_v10, %v4754_v6 }
 0x38f   :  { %v4796_v24 = vpop.f32.mrf.mxu0 }
 0x390   :  { %v4837_v25 = vpop.f32.mrf.mxu1  ;;  %v4836_v7 = vadd.f32 %v4835_v11, %v4795_v14  ;;  %v4797_v16 = vadd.f32 %v4796_v24, %v4756_v13 }
 0x391   :  { %v4798_v27 = vpop.f32.mrf.mxu0 }
 0x392   :  { %v4839_v61 = vpop.f32.mrf.mxu1  ;;  %v4866_v59 = vadd.f32 %v4855_v23, %v4836_v7  ;;  %v4838_v28 = vadd.f32 %v4837_v25, %v4797_v16 }
 0x393   :  { %v4799_v35 = vpop.f32.mrf.mxu0 }
 0x394   :  { %v4840_v2 = vpop.f32.mrf.mxu1  ;;  %v4870_v20 = vmax.f32 %v4866_v59, 0.0  ;;  %v4867_v21 = vadd.f32 %v4859_v26, %v4838_v28 }
 0x396   :  { %v4871_v22 = vmax.f32 %v4867_v21, 0.0  ;;  %v4896_v30 = vmul.f32 %v4885_v29, %v4870_v20 }
 0x398   :  { %v4897_v38 = vmul.f32 %v4889_v36, %v4871_v22  ;;  %v4899_v40 = vadd.f32 %v6929_v50, %v4896_v30 }
 0x39a   :  { %v4900_v3 = vadd.f32 %v4899_v40, %v4897_v38 }
 0x39c   :  { %4901 = vadd.xlane.f32.xlu0 %v4900_v3 }
 0x425   :  { %v4902_v33 = vpop.xlane.xlu0 %4901 }
 0x426   :  { %v4910_v41 = vadd.f32 %v5581_v17, %v4902_v33 }
 0x428   :  { %4912 = vst.msk [vmem:[%s6952_s7] sm:$0xff] %vm4911_vm0, %v4910_v41 }
 0x429   :  { %4917 = vsyncpa [#allocation4], 1 }
 0x42a   :  { %4918 = vsyncpa [#allocation6], 1 }
 0x42b   :  { %4919 = vsyncpa [#allocation9], 1 }
 0x42c   :  { %4920 = vsyncpa [#allocation12], 1 }

</bundles_post_ra>
